<compile_context>
chip_gen: v7x
topology: tpu7x:2x2x1
jax: 0.10.0
libtpu: 0.0.40
codegen_flags: <defaults>
</compile_context>

<pallas_src>
import jax
import jax.numpy as jnp
from jax.experimental import pallas as pl
from jax.experimental.pallas import tpu as pltpu


# --------------------------- fused expert kernel ----------------------------
def moe_expert_kernel(x_ref, cw_ref, w1_ref, b1_ref, w2_ref, b2_ref, out_ref):
    x = x_ref[...]                                   # (tm, D)   model dtype
    cw = cw_ref[...]                                 # (tm, E)   f32 combine weights
    tm = x.shape[0]
    E, D = b2_ref.shape
    H = w1_ref.shape[1] // E

    # Fused expert-1 matmul across the whole expert bank: one large-N MXU op.
    h = jnp.dot(x, w1_ref[...], preferred_element_type=jnp.float32)   # (tm, E*H) f32
    h = jnp.maximum(h + b1_ref[...].astype(jnp.float32), 0.0)
    # TODO(synk): nn.Dropout(p=0.1) omitted — inference/eval-mode identity.

    # Pre-scale each expert's H-slice by its per-token combine weight (f32) so the
    # expert sum folds into the K-reduction of the second matmul. Static lane slices
    # only (H is a multiple of 128) + VPU broadcasts — no XLU where/reduce.
    b2f = b2_ref[...].astype(jnp.float32)            # (E, D)
    bias2 = jnp.zeros((tm, D), jnp.float32)
    parts = []
    for e in range(E):
        w_e = cw[:, e:e + 1]                         # (tm, 1) static lane slice
        parts.append((h[:, e * H:(e + 1) * H] * w_e).astype(x.dtype))
        bias2 = bias2 + w_e * b2f[e:e + 1, :]        # cw-weighted expert-2 bias
    h_s = jnp.concatenate(parts, axis=1)             # (tm, E*H) model dtype

    # Fused expert-2 matmul: K = E*H fully feeds the MXU depth; the expert sum
    # happens inside the f32 matmul accumulator.
    y = jnp.dot(h_s, w2_ref[...], preferred_element_type=jnp.float32)  # (tm, D) f32
    out_ref[...] = (y + bias2).astype(out_ref.dtype)


def moe_experts(x_flat, cw, w1_all, b1_all, w2_all, b2_all, tm):
    T, D = x_flat.shape
    EH = w1_all.shape[1]
    E = b2_all.shape[0]
    return pl.pallas_call(
        moe_expert_kernel,
        out_shape=jax.ShapeDtypeStruct((T, D), x_flat.dtype),
        grid_spec=pltpu.PrefetchScalarGridSpec(
            num_scalar_prefetch=0,
            grid=(pl.cdiv(T, tm),),                  # partial last tile handled by Pallas
            in_specs=[
                pl.BlockSpec((tm, D), lambda t: (t, 0)),    # x tile
                pl.BlockSpec((tm, E), lambda t: (t, 0)),    # combine weights (f32)
                pl.BlockSpec((D, EH), lambda t: (0, 0)),    # fused W1 (VMEM-resident)
                pl.BlockSpec((1, EH), lambda t: (0, 0)),    # fused b1
                pl.BlockSpec((EH, D), lambda t: (0, 0)),    # fused W2 (VMEM-resident)
                pl.BlockSpec((E, D), lambda t: (0, 0)),     # b2 rows
            ],
            out_specs=pl.BlockSpec((tm, D), lambda t: (t, 0)),  # lane-dense output
        ),
        compiler_params=pltpu.CompilerParams(
            dimension_semantics=("parallel",),
            vmem_limit_bytes=32 * 1024 * 1024,   # ~3 MiB actually used at tm=128; headroom for bigger tiles
        ),
    )(x_flat, cw, w1_all, b1_all, w2_all, b2_all)


# ------------------------------ routing (XLA) --------------------------------
def _route(x_flat, wg, top_k, n_experts):
    """gate -> top_k -> softmax -> dense per-expert combine weights (f32)."""
    gate_out = jnp.dot(x_flat, wg, preferred_element_type=jnp.float32)   # (T, E)
    weights, selected = jax.lax.top_k(gate_out, top_k)                   # (T, K)
    weights = jax.nn.softmax(weights, axis=-1).astype(x_flat.dtype)      # as torch
    one_hot = jax.nn.one_hot(selected, n_experts, dtype=jnp.float32)     # (T, K, E)
    cw = jnp.sum(weights.astype(jnp.float32)[..., None] * one_hot, axis=1)
    return cw, selected                                                  # (T,E), (T,K)


# ------------------------------ wrapper --------------------------------------
def moe_forward(x, params, top_k, tm=128):
    B, S, D = x.shape
    T = B * S
    E = params["wg"].shape[1]
    H = params["w1"].shape[2]
    x_flat = x.reshape(T, D)

    cw, selected = _route(x_flat, params["wg"], top_k, E)

    # One-time layout flattening of the expert bank (in production, store the
    # weights in this layout so no transpose/reshape is needed per call).
    w1_all = jnp.transpose(params["w1"], (1, 0, 2)).reshape(D, E * H)    # (D, E*H)
    b1_all = params["b1"].reshape(1, E * H)                              # (1, E*H)
    w2_all = params["w2"].reshape(E * H, D)                              # (E*H, D)
    b2_all = params["b2"].reshape(E, D)                                  # (E, D)

    out_flat = moe_experts(x_flat, cw, w1_all, b1_all, w2_all, b2_all, tm)
    return out_flat.reshape(B, S, D), selected.reshape(B, S, top_k)


# --------------------------- params / reference ------------------------------
def init_params(key, n_experts, embedding_dim, moe_hidden, dtype=jnp.float32):
    D, H, E = embedding_dim, moe_hidden, n_experts
    kg, k1, kb1, k2, kb2 = jax.random.split(key, 5)
    lg, l1, l2 = 1.0 / D ** 0.5, 1.0 / D ** 0.5, 1.0 / H ** 0.5

    def u(k, shape, lim):
        return jax.random.uniform(k, shape, jnp.float32, -lim, lim).astype(dtype)

    return {
        "wg": u(kg, (D, E), lg),
        "w1": u(k1, (E, D, H), l1),
        "b1": u(kb1, (E, 1, H), l1),
        "w2": u(k2, (E, H, D), l2),
        "b2": u(kb2, (E, 1, D), l2),
    }


def ref_forward(x, params, top_k):
    """Pure-JAX per-expert reference (dense masked form of the torch module)."""
    B, S, D = x.shape
    T = B * S
    E = params["wg"].shape[1]
    x_flat = x.reshape(T, D)
    cw, selected = _route(x_flat, params["wg"], top_k, E)
    out = jnp.zeros((T, D), jnp.float32)
    for e in range(E):
        h = jnp.dot(x_flat, params["w1"][e], preferred_element_type=jnp.float32)
        h = jnp.maximum(h + params["b1"][e].astype(jnp.float32), 0.0)
        y = jnp.dot(h.astype(x.dtype), params["w2"][e],
                    preferred_element_type=jnp.float32)
        y = y + params["b2"][e].astype(jnp.float32)
        out = out + cw[:, e:e + 1] * y
    return out.astype(x.dtype).reshape(B, S, D), selected.reshape(B, S, top_k)


# ------------------------------- main ----------------------------------------
if __name__ == "__main__":
    B, S, D, H = 2, 120, 128, 256     # T = 240 tokens -> 2 token tiles (partial last tile)
    E, K = 4, 2                       # n_experts, top_k_experts
    TM = 128

    key = jax.random.PRNGKey(0)
    kx, kp = jax.random.split(key)

    # bf16 (MXU-friendly) and a f32 sanity check
    for dtype, tol in ((jnp.bfloat16, 3e-2), (jnp.float32, 5e-3)):
        x = jax.random.normal(kx, (B, S, D), dtype=jnp.float32).astype(dtype)
        params = init_params(kp, E, D, H, dtype=dtype)

        out, selected = moe_forward(x, params, K, tm=TM)
        out = jax.block_until_ready(out)
        selected = jax.block_until_ready(selected)

        ref_out, ref_sel = ref_forward(x, params, K)
        assert out.shape == (B, S, D) and selected.shape == (B, S, K)
        assert jnp.array_equal(selected, ref_sel), f"{dtype}: selection mismatch"
        err = jnp.max(jnp.abs(out.astype(jnp.float32) - ref_out.astype(jnp.float32)))
        assert err <= tol, f"{dtype}: output mismatch (max abs err {err})"

    print("KERNEL_OK")
</pallas_src>

<mosaic_0001>
module attributes {stable_mosaic.version = 11 : i64} {
  func.func @moe_expert_kernel(%arg0: i32, %arg1: memref<128x128xbf16, #tpu.memory_space<vmem>>, %arg2: memref<128x4xf32, #tpu.memory_space<vmem>>, %arg3: memref<128x1024xbf16, #tpu.memory_space<vmem>>, %arg4: memref<1x1024xbf16, #tpu.memory_space<vmem>>, %arg5: memref<1024x128xbf16, #tpu.memory_space<vmem>>, %arg6: memref<4x128xbf16, #tpu.memory_space<vmem>>, %arg7: memref<128x128xbf16, #tpu.memory_space<vmem>>) attributes {dimension_semantics = [#tpu.dimension_semantics<parallel>], iteration_bounds = array<i64: 2>, scalar_prefetch = 0 : i64, scratch_operands = 0 : i64, tpu.core_type = #tpu.core_type<tc>, window_params = [{transform_indices = @transform_0, window_bounds = array<i64: 128, 128>}, {transform_indices = @transform_1, window_bounds = array<i64: 128, 4>}, {pipeline_mode = #tpu.pipeline_mode<synchronous>, transform_indices = @transform_2, window_bounds = array<i64: 128, 1024>}, {pipeline_mode = #tpu.pipeline_mode<synchronous>, transform_indices = @transform_3, window_bounds = array<i64: 1, 1024>}, {pipeline_mode = #tpu.pipeline_mode<synchronous>, transform_indices = @transform_4, window_bounds = array<i64: 1024, 128>}, {pipeline_mode = #tpu.pipeline_mode<synchronous>, transform_indices = @transform_5, window_bounds = array<i64: 4, 128>}, {transform_indices = @transform_6, window_bounds = array<i64: 128, 128>}]} {
    %c0 = arith.constant 0 : index
    %c0_0 = arith.constant 0 : index
    %0 = vector.load %arg1[%c0, %c0_0] : memref<128x128xbf16, #tpu.memory_space<vmem>>, vector<128x128xbf16>
    %c0_1 = arith.constant 0 : index
    %c0_2 = arith.constant 0 : index
    %1 = vector.load %arg2[%c0_1, %c0_2] : memref<128x4xf32, #tpu.memory_space<vmem>>, vector<128x4xf32>
    %c0_3 = arith.constant 0 : index
    %c0_4 = arith.constant 0 : index
    %2 = vector.load %arg3[%c0_3, %c0_4] : memref<128x1024xbf16, #tpu.memory_space<vmem>>, vector<128x1024xbf16>
    %cst = arith.constant dense<0.000000e+00> : vector<128x1024xf32>
    %3 = tpu.matmul %0, %2, %cst {dimension_numbers = #tpu.dot_dimension_numbers<[1], [0], [0], [1], [0, 0, 1, 1], [], []>} : vector<128x128xbf16>, vector<128x1024xbf16>, vector<128x1024xf32> -> vector<128x1024xf32>
    %c0_5 = arith.constant 0 : index
    %c0_6 = arith.constant 0 : index
    %4 = vector.load %arg4[%c0_5, %c0_6] : memref<1x1024xbf16, #tpu.memory_space<vmem>>, vector<1x1024xbf16>
    %5 = arith.extf %4 : vector<1x1024xbf16> to vector<1x1024xf32>
    %6 = vector.broadcast %5 : vector<1x1024xf32> to vector<128x1024xf32>
    %7 = arith.addf %3, %6 : vector<128x1024xf32>
    %cst_7 = arith.constant 0.000000e+00 : f32
    %8 = vector.broadcast %cst_7 : f32 to vector<128x1024xf32>
    %9 = arith.maximumf %7, %8 : vector<128x1024xf32>
    %c0_8 = arith.constant 0 : index
    %c0_9 = arith.constant 0 : index
    %10 = vector.load %arg6[%c0_8, %c0_9] : memref<4x128xbf16, #tpu.memory_space<vmem>>, vector<4x128xbf16>
    %11 = arith.extf %10 : vector<4x128xbf16> to vector<4x128xf32>
    %cst_10 = arith.constant 0.000000e+00 : f32
    %12 = vector.broadcast %cst_10 : f32 to vector<128x128xf32>
    %13 = vector.extract_strided_slice %1 {offsets = [0, 0], sizes = [128, 1], strides = [1, 1]} : vector<128x4xf32> to vector<128x1xf32>
    %14 = vector.extract_strided_slice %9 {offsets = [0, 0], sizes = [128, 256], strides = [1, 1]} : vector<128x1024xf32> to vector<128x256xf32>
    %15 = vector.broadcast %13 : vector<128x1xf32> to vector<128x256xf32>
    %16 = arith.mulf %14, %15 : vector<128x256xf32>
    %17 = arith.truncf %16 : vector<128x256xf32> to vector<128x256xbf16>
    %18 = vector.extract_strided_slice %11 {offsets = [0, 0], sizes = [1, 128], strides = [1, 1]} : vector<4x128xf32> to vector<1x128xf32>
    %19 = vector.broadcast %13 : vector<128x1xf32> to vector<128x128xf32>
    %20 = vector.broadcast %18 : vector<1x128xf32> to vector<128x128xf32>
    %21 = arith.mulf %19, %20 : vector<128x128xf32>
    %22 = arith.addf %12, %21 : vector<128x128xf32>
    %23 = vector.extract_strided_slice %1 {offsets = [0, 1], sizes = [128, 1], strides = [1, 1]} : vector<128x4xf32> to vector<128x1xf32>
    %24 = vector.extract_strided_slice %9 {offsets = [0, 256], sizes = [128, 256], strides = [1, 1]} : vector<128x1024xf32> to vector<128x256xf32>
    %25 = vector.broadcast %23 : vector<128x1xf32> to vector<128x256xf32>
    %26 = arith.mulf %24, %25 : vector<128x256xf32>
    %27 = arith.truncf %26 : vector<128x256xf32> to vector<128x256xbf16>
    %28 = vector.extract_strided_slice %11 {offsets = [1, 0], sizes = [1, 128], strides = [1, 1]} : vector<4x128xf32> to vector<1x128xf32>
    %29 = vector.broadcast %23 : vector<128x1xf32> to vector<128x128xf32>
    %30 = vector.broadcast %28 : vector<1x128xf32> to vector<128x128xf32>
    %31 = arith.mulf %29, %30 : vector<128x128xf32>
    %32 = arith.addf %22, %31 : vector<128x128xf32>
    %33 = vector.extract_strided_slice %1 {offsets = [0, 2], sizes = [128, 1], strides = [1, 1]} : vector<128x4xf32> to vector<128x1xf32>
    %34 = vector.extract_strided_slice %9 {offsets = [0, 512], sizes = [128, 256], strides = [1, 1]} : vector<128x1024xf32> to vector<128x256xf32>
    %35 = vector.broadcast %33 : vector<128x1xf32> to vector<128x256xf32>
    %36 = arith.mulf %34, %35 : vector<128x256xf32>
    %37 = arith.truncf %36 : vector<128x256xf32> to vector<128x256xbf16>
    %38 = vector.extract_strided_slice %11 {offsets = [2, 0], sizes = [1, 128], strides = [1, 1]} : vector<4x128xf32> to vector<1x128xf32>
    %39 = vector.broadcast %33 : vector<128x1xf32> to vector<128x128xf32>
    %40 = vector.broadcast %38 : vector<1x128xf32> to vector<128x128xf32>
    %41 = arith.mulf %39, %40 : vector<128x128xf32>
    %42 = arith.addf %32, %41 : vector<128x128xf32>
    %43 = vector.extract_strided_slice %1 {offsets = [0, 3], sizes = [128, 1], strides = [1, 1]} : vector<128x4xf32> to vector<128x1xf32>
    %44 = vector.extract_strided_slice %9 {offsets = [0, 768], sizes = [128, 256], strides = [1, 1]} : vector<128x1024xf32> to vector<128x256xf32>
    %45 = vector.broadcast %43 : vector<128x1xf32> to vector<128x256xf32>
    %46 = arith.mulf %44, %45 : vector<128x256xf32>
    %47 = arith.truncf %46 : vector<128x256xf32> to vector<128x256xbf16>
    %48 = vector.extract_strided_slice %11 {offsets = [3, 0], sizes = [1, 128], strides = [1, 1]} : vector<4x128xf32> to vector<1x128xf32>
    %49 = vector.broadcast %43 : vector<128x1xf32> to vector<128x128xf32>
    %50 = vector.broadcast %48 : vector<1x128xf32> to vector<128x128xf32>
    %51 = arith.mulf %49, %50 : vector<128x128xf32>
    %52 = arith.addf %42, %51 : vector<128x128xf32>
    %53 = tpu.concatenate %17, %27, %37, %47 in 1 : vector<128x256xbf16>, vector<128x256xbf16>, vector<128x256xbf16>, vector<128x256xbf16> -> vector<128x1024xbf16>
    %c0_11 = arith.constant 0 : index
    %c0_12 = arith.constant 0 : index
    %54 = vector.load %arg5[%c0_11, %c0_12] : memref<1024x128xbf16, #tpu.memory_space<vmem>>, vector<1024x128xbf16>
    %cst_13 = arith.constant dense<0.000000e+00> : vector<128x128xf32>
    %55 = tpu.matmul %53, %54, %cst_13 {dimension_numbers = #tpu.dot_dimension_numbers<[1], [0], [0], [1], [0, 0, 1, 1], [], []>} : vector<128x1024xbf16>, vector<1024x128xbf16>, vector<128x128xf32> -> vector<128x128xf32>
    %56 = arith.addf %55, %52 : vector<128x128xf32>
    %57 = arith.truncf %56 : vector<128x128xf32> to vector<128x128xbf16>
    %c0_14 = arith.constant 0 : index
    %c0_15 = arith.constant 0 : index
    %58 = vector.load %arg7[%c0_14, %c0_15] : memref<128x128xbf16, #tpu.memory_space<vmem>>, vector<128x128xbf16>
    tpu.vector_store %arg7[%c0_14, %c0_15], %57 {strides = array<i32>} : memref<128x128xbf16, #tpu.memory_space<vmem>>, vector<128x128xbf16>,
    return
  }
  func.func @transform_0(%arg0: i32) -> (i32, i32) {
    %c0_i32 = arith.constant 0 : i32
    %c0_i32_0 = arith.constant 0 : i32
    return %arg0, %c0_i32 : i32, i32
  }
  func.func @transform_1(%arg0: i32) -> (i32, i32) {
    %c0_i32 = arith.constant 0 : i32
    %c0_i32_0 = arith.constant 0 : i32
    return %arg0, %c0_i32 : i32, i32
  }
  func.func @transform_2(%arg0: i32) -> (i32, i32) {
    %c0_i32 = arith.constant 0 : i32
    %c0_i32_0 = arith.constant 0 : i32
    %c0_i32_1 = arith.constant 0 : i32
    return %c0_i32, %c0_i32_0 : i32, i32
  }
  func.func @transform_3(%arg0: i32) -> (i32, i32) {
    %c0_i32 = arith.constant 0 : i32
    %c0_i32_0 = arith.constant 0 : i32
    %c0_i32_1 = arith.constant 0 : i32
    return %c0_i32, %c0_i32_0 : i32, i32
  }
  func.func @transform_4(%arg0: i32) -> (i32, i32) {
    %c0_i32 = arith.constant 0 : i32
    %c0_i32_0 = arith.constant 0 : i32
    %c0_i32_1 = arith.constant 0 : i32
    return %c0_i32, %c0_i32_0 : i32, i32
  }
  func.func @transform_5(%arg0: i32) -> (i32, i32) {
    %c0_i32 = arith.constant 0 : i32
    %c0_i32_0 = arith.constant 0 : i32
    %c0_i32_1 = arith.constant 0 : i32
    return %c0_i32, %c0_i32_0 : i32, i32
  }
  func.func @transform_6(%arg0: i32) -> (i32, i32) {
    %c0_i32 = arith.constant 0 : i32
    %c0_i32_0 = arith.constant 0 : i32
    return %arg0, %c0_i32 : i32, i32
  }
}

</mosaic_0001>

<bundles_post_ra>
// kernel: tpu_custom_call.1
= control target key start
LH: loop header
LB: loop body
LE: loop exit
PB: predicated region body
PF: predicated region fallthrough
CT: control target
= control target key end

     0   :  { %11 = vsyncpa [#allocation3], 0  ;;  %s5204_s0 = inlined_call_operand.vmem [shape: bf16[240,128], index: 0, kind: input, shape index: {}]   ;;  %s5205_s1 = inlined_call_operand.vmem [shape: f32[240,4], index: 1, kind: input, shape index: {}]   ;;  %s5206_s2 = inlined_call_operand.hbm [shape: bf16[128,1024], index: 2, kind: input, shape index: {}]   ;;  %s5207_s3 = inlined_call_operand.vmem [shape: bf16[1,1024], index: 3, kind: input, shape index: {}]   ;;  %s5208_s4 = inlined_call_operand.hbm [shape: bf16[1024,128], index: 4, kind: input, shape index: {}]   ;;  %s5209_s5 = inlined_call_operand.vmem [shape: bf16[4,128], index: 5, kind: input, shape index: {}]   ;;  %s5210_s6 = inlined_call_operand.hbm [shape: bf16[240,128], index: 6, kind: output, shape index: {}]  }
   0x1   :  { %12 = vsyncpa [#allocation6], 0 }
   0x2   :  { %13 = vsyncpa [#allocation4], 0 }
   0x3   :  { %15 = vsyncpa [#allocation4 + $0x1], 0  ;;  %s4031_s21 = smov 0   ;;  %s4033_s22 = smov 0  }
   0x4   :  { %s4035_s23 = smov 0   ;;  %s4037_s24 = smov 0  }
   0x5 LB: > { %s4052_s25 = sadd.s32 4294967295, %s3981_s24   ;;  %s3177_s26 = sadd.s32 4294967294, %s3981_s24   ;;  %s3981_s24 = sphi %s4037_s24, %s5334_s24   ;;  %s3977_s23 = sphi %s4035_s23, %s5333_s23   ;;  %s3973_s22 = sphi %s4033_s22, %s5332_s22   ;;  %s3969_s21 = sphi %s4031_s21, %s5331_s21  }
   0x6   : > { %s4056_s27 = sadd.s32 1, %s3981_s24   ;;  %s164_s28 = sadd.s32 1, %s3977_s23 }
   0x7   : > { %s161_s29 = ssub.s32 %s3981_s24, %s4056_s27  ;;  %p174_p0 = scmp.ne.s32.totalorder %s3977_s23, %s3973_s22 }
   0x8   : > { %p162_p1 = scmp.eq.s32.totalorder %s161_s29, 0  ;;  %p175_p2 = scmp.eq.s32.totalorder %s4052_s25, 1 }
   0x9   : > { %p180_p3 = scmp.ne.s32.totalorder %s3973_s22, %s3969_s21  ;;  %p181_p4 = scmp.eq.s32.totalorder %s3177_s26, 1 }
   0xa   : > { %s4067_s30 = scalar_select %p162_p1, %s3977_s23, %s164_s28  }
   0xb   : > { %p4069_p5 = por %p175_p2, %p174_p0  ;;  %p4073_p6 = por %p181_p4, %p180_p3 }
   0xc   : > { %p3178_p7 = scmp.ge.s32.totalorder %s3981_s24, 1  ;;  %p188_p8 = scmp.lt.s32.totalorder %s3981_s24, 3 }
   0xd   : > { %s5249_s7 = scalar_select %p4069_p5, 1, 0 }
   0xe   : > { %s5250_s8 = scalar_select %p4073_p6, 1, 0 }
   0xf   : > { %p5211_p9 = scmp.eq.s32.totalorder %s4052_s25, 0  ;;  %p4080_p10 = pnand %p3178_p7, %p188_p8 }
  0x10   : > { %s3983_s10 = smov [#allocation2]   ;;  %s3984_s13 = smov [#allocation5]  }
  0x11   : > { %s5251_s9 = scalar_select %p4080_p10, 1, 0 }
  0x12   : > { %s200_s11 = sshll.u32 %s3983_s10, 4  ;;  %p3680_p11 = pneg %p4080_p10  ;;  %s201_s11 = int_to_ptr.vmem [resolvable:$true] %s200_s11 }
  0x13   : > { %s216_s14 = sshll.u32 %s3984_s13, 4  ;;  %s3855_s17 = scalar_lea.hbm %s5206_s2, 8192  ;;  %s4092_s14 = int_to_ptr.vmem [resolvable:$true] %s216_s14 }
  0x14   : > { %p4088_p12 = pnand %p5211_p9, %p3680_p11  ;;  %p3856_p13 = scmp.ne.s32.totalorder %s5206_s2, %s3855_s17 }
  0x15   : > { %p3862_p3 = scmp.lt.u32.totalorder %s3855_s17, %s5206_s2 }
  0x16   : > { %p3857_p0 = pneg %p4088_p12 }
  0x18   : > { %p3858_p1 = pnand %p3857_p0, %p3856_p13 }
  0x1a   : > { %p3859_p2 = pneg %p3858_p1 }
  0x1c   : > { %p3864_p4 = pnand %p3862_p3, %p3859_p2 }
  0x1e   : > { %3867 = shalt.err (!%p3864_p4)
}
  0x1f   : > { %s3868_s28 = scalar_lea.vmem %s201_s11, 8192  ;;  %p3876_p9 = scmp.lt.s32.totalorder %s201_s11, %s201_s11 }
  0x20   : > { %p3869_p7 = scmp.ne.s32.totalorder %s201_s11, %s3868_s28  ;;  %p3877_p6 = scmp.lt.s32.totalorder %s3868_s28, %s3868_s28 }
  0x22   : > { %p3871_p8 = pnand %p3869_p7, %p3857_p0  ;;  %p3878_p5 = por %p3877_p6, %p3876_p9 }
  0x24   : > { %p3872_p11 = pneg %p3871_p8 }
  0x26   : > { %p3879_p10 = pnand %p3878_p5, %p3872_p11 }
  0x28   : > { %3882 = shalt.err (!%p3879_p10)
}
  0x29   : > { %s3985_s29 = smov 512   ;;  %s3986_s10 = smov 32  }
  0x2a   : > { %3683 = dma.hbm_to_vmem [thread:$0]  (!%p4088_p12), %s5206_s2, 8192, %s201_s11, [#allocation3], %s3985_s29, %s3985_s29, %s3986_s10  }
  0x2b   : > { %s3883_s18 = scalar_lea.hbm %s5208_s4, 8192 }
  0x2c   : > { %p3884_p13 = scmp.ne.s32.totalorder %s5208_s4, %s3883_s18  ;;  %p3890_p9 = scmp.lt.u32.totalorder %s3883_s18, %s5208_s4 }
  0x2e   : > { %p3886_p5 = pnand %p3884_p13, %p3857_p0 }
  0x30   : > { %p3887_p6 = pneg %p3886_p5 }
  0x32   : > { %p3892_p10 = pnand %p3890_p9, %p3887_p6 }
  0x34   : > { %3895 = shalt.err (!%p3892_p10)
}
  0x35   : > { %s3896_s11 = scalar_lea.vmem %s4092_s14, 8192  ;;  %p3904_p4 = scmp.lt.s32.totalorder %s4092_s14, %s4092_s14 }
  0x36   : > { %p3897_p1 = scmp.ne.s32.totalorder %s4092_s14, %s3896_s11  ;;  %p3905_p7 = scmp.lt.s32.totalorder %s3896_s11, %s3896_s11 }
  0x38   : > { %p3899_p2 = pnand %p3897_p1, %p3857_p0  ;;  %p3906_p8 = por %p3905_p7, %p3904_p4 }
  0x3a   : > { %p3900_p3 = pneg %p3899_p2 }
  0x3c   : > { %p3907_p11 = pnand %p3906_p8, %p3900_p3 }
  0x3e   : > { %3910 = shalt.err (!%p3907_p11)
}
  0x3f   : > { %s3987_s29 = smov 64   ;;  %s3988_s10 = smov 4  }
  0x40   : > { %3686 = dma.hbm_to_vmem [thread:$0]  (!%p4088_p12), %s5208_s4, 8192, %s4092_s14, [#allocation6], %s3987_s29, %s3987_s29, %s3988_s10  }
  0x41   : > { %p5253_p13 = scmp.ne.s32.totalorder %s5251_s9, 0 }
  0x43   : > { %269 = sbr.rel (%p5253_p13) target bundleno = 719 (0x2cf), region = 44 }
  0x4a   : > { %p5254_p0 = scmp.eq.s32.totalorder %s4052_s25, 0 }
  0x4c   : > { %3956 = dma.done.wait (%p5254_p0), [#allocation3], 8192   ;;  %p5255_p5 = pmov %p5254_p0 }
  0x4d   : > { %p5256_p6 = pmov %p5254_p0 }
  0x4e   : > { %3958 = vsyncadd (%p5255_p5), [#allocation3], 4294959104 }
  0x4f   : > { %3960 = dma.done.wait (%p5256_p6), [#allocation6], 8192   ;;  %p5257_p9 = pmov %p5254_p0 }
  0x50   : > { %s4152_s12 = sshll.u32 %s4052_s25, 4  ;;  %v3989_v0 = vmov 1   ;;  %v3990_v1 = vmov 0   ;;  %v382_v3 = vld [vmem:[#allocation2] sm:$0xff]  ;;  %v383_v6 = vld [vmem:[#allocation2 + $0x8] sm:$0xff]  ;;  %s313_s10 = sand.u32 1, %s3973_s22  }
  0x51   : > { %3962 = vsyncadd (%p5257_p9), [#allocation6], 4294959104  ;;  %3741 = vset.pattern.permute.xlu1 %v3989_v0  ;;  %p321_p12 = scmp.lt.s32.totalorder %s4152_s12, 29  ;;  %3740 = vset.pattern.permute.xlu0 %v3990_v1  ;;  %v386_v4 = vld [vmem:[#allocation2 + $0x20] sm:$0xff]  ;;  %v387_v7 = vld [vmem:[#allocation2 + $0x28] sm:$0xff]  ;;  %s5143_s16 = scalar_lea.sflag [#allocation4], %s313_s10 }
  0x52   : > { %923 = vmatprep.mubr.bf16.mxu0 %v3990_v1  ;;  %1036 = vmatprep.mubr.bf16.mxu1 %v3990_v1  ;;  %v3199_v5 = vcombine.high %v382_v3, %v386_v4  ;;  %v3198_v8 = vcombine.low %v382_v3, %v386_v4  ;;  %v3201_v10 = vcombine.high %v383_v6, %v387_v7  ;;  %v390_v12 = vld [vmem:[#allocation2 + $0x40] sm:$0xff]  ;;  %v391_v14 = vld [vmem:[#allocation2 + $0x48] sm:$0xff]  ;;  %p5329_p10 = scmp.ne.s32.totalorder %s5249_s7, 0 }
  0x53   : > { %s4160_s9 = scalar_select %p321_p12, %s4152_s12, 29  ;;  %v3200_v11 = vcombine.low %v383_v6, %v387_v7  ;;  %v394_v13 = vld [vmem:[#allocation2 + $0x60] sm:$0xff]  ;;  %v395_v16 = vld [vmem:[#allocation2 + $0x68] sm:$0xff] }
  0x54   : > { %891 = vmatprep.subr.bf16.mxu0 %v3199_v5  ;;  %v3207_v15 = vcombine.high %v390_v12, %v394_v13  ;;  %v398_v17 = vld [vmem:[#allocation2 + $0x80] sm:$0xff]  ;;  %1004 = vmatprep.subr.bf16.mxu1 %v3201_v10  ;;  %v3209_v18 = vcombine.high %v391_v14, %v395_v16  ;;  %v3206_v19 = vcombine.low %v390_v12, %v394_v13  ;;  %v399_v21 = vld [vmem:[#allocation2 + $0x88] sm:$0xff]  ;;  %v388_v12 = vld [vmem:[#allocation2 + $0x30] sm:$0xff]  ;;  %s3070_s17 = ssub.s32 (%p5329_p10), 30, %s4152_s12 }
  0x55   : > { %s3189_s14 = sshll.u32 %s4160_s9, 3  ;;  %892 = vmatpush1.bf16.msra.mxu0 %v3198_v8  ;;  %v402_v20 = vld [vmem:[#allocation2 + $0xa0] sm:$0xff]  ;;  %v403_v22 = vld [vmem:[#allocation2 + $0xa8] sm:$0xff]  ;;  %1005 = vmatpush1.bf16.msra.mxu1 %v3200_v11  ;;  %v3208_v23 = vcombine.low %v391_v14, %v395_v16  ;;  %s3187_s19 = sshll.u32 %s4160_s9, 2  ;;  %v384_v11 = vld [vmem:[#allocation2 + $0x10] sm:$0xff] }
  0x56   : > { %s4166_s18 = scalar_lea.vmem %s5205_s1, %s3189_s14  ;;  %893 = vmatprep.subr.bf16.mxu0 %v3207_v15  ;;  %1006 = vmatprep.subr.bf16.mxu1 %v3209_v18  ;;  %v3215_v24 = vcombine.high %v398_v17, %v402_v20  ;;  %v406_v25 = vld [vmem:[#allocation2 + $0xc0] sm:$0xff]  ;;  %v3217_v29 = vcombine.high %v399_v21, %v403_v22  ;;  %v407_v30 = vld [vmem:[#allocation2 + $0xc8] sm:$0xff]  ;;  %v3214_v32 = vcombine.low %v398_v17, %v402_v20  ;;  %s4191_s28 = scalar_lea.vmem %s5204_s0, %s3187_s19  ;;  %v385_v14 = vld [vmem:[#allocation2 + $0x18] sm:$0xff] }
  0x57   : > { %v4169_v2 = vld [vmem:[%s4166_s18] sm:$0xff]  ;;  %v4173_v9 = vld [vmem:[%s4166_s18 + $0x8] sm:$0xff]  ;;  %v4178_v27 = vld [vmem:[%s4166_s18 + $0x10] sm:$0xff]  ;;  %v3216_v33 = vcombine.low %v399_v21, %v403_v22  ;;  %v3203_v17 = vcombine.high %v384_v11, %v388_v12  ;;  %v3202_v21 = vcombine.low %v384_v11, %v388_v12  ;;  %s3185_s9 = sshll.u32 %s313_s10, 6  ;;  %p3071_p1 = scmp.lt.s32.totalorder (%p5329_p10), %s3070_s17, 16 }
  0x58   : > { %1638 = vperm.xlu1 %3741, %v4169_v2   ;;  %1475 = vperm.xlu0 %3740, %v4169_v2   ;;  %v410_v26 = vld [vmem:[#allocation2 + $0xe0] sm:$0xff]  ;;  %v4181_v28 = vld [vmem:[%s4166_s18 + $0x18] sm:$0xff]  ;;  %v411_v31 = vld [vmem:[#allocation2 + $0xe8] sm:$0xff]  ;;  %s5117_s14 = scalar_lea.vmem [#allocation7], %s3185_s9 }
  0x59   : > { %894 = vmatpush1.bf16.msra.mxu0 %v3206_v19  ;;  %1007 = vmatpush1.bf16.msra.mxu1 %v3208_v23  ;;  %v3223_v34 = vcombine.high %v406_v25, %v410_v26  ;;  %v3225_v35 = vcombine.high %v407_v30, %v411_v31  ;;  %v414_v36 = vld [vmem:[#allocation2 + $0x100] sm:$0xff]  ;;  %v415_v38 = vld [vmem:[#allocation2 + $0x108] sm:$0xff]  ;;  %v3222_v40 = vcombine.low %v406_v25, %v410_v26  ;;  %v4209_v6 = vld [vmem:[%s4166_s18 + $0x30] sm:$0xff] }
  0x5a   : > { %895 = vmatprep.subr.bf16.mxu0 %v3215_v24  ;;  %v418_v37 = vld [vmem:[#allocation2 + $0x120] sm:$0xff]  ;;  %1008 = vmatprep.subr.bf16.mxu1 %v3217_v29  ;;  %v419_v39 = vld [vmem:[#allocation2 + $0x128] sm:$0xff]  ;;  %v3224_v41 = vcombine.low %v407_v30, %v411_v31  ;;  %v389_v15 = vld [vmem:[#allocation2 + $0x38] sm:$0xff] }
  0x5b   : > { %v3231_v42 = vcombine.high %v414_v36, %v418_v37  ;;  %v3233_v43 = vcombine.high %v415_v38, %v419_v39  ;;  %v422_v44 = vld [vmem:[#allocation2 + $0x140] sm:$0xff]  ;;  %v423_v46 = vld [vmem:[#allocation2 + $0x148] sm:$0xff]  ;;  %v3230_v48 = vcombine.low %v414_v36, %v418_v37  ;;  %v3232_v49 = vcombine.low %v415_v38, %v419_v39  ;;  %v4215_v18 = vld [vmem:[%s4166_s18 + $0x38] sm:$0xff] }
  0x5c   : > { %1642 = vperm.xlu1 %3741, %v4173_v9   ;;  %3743 = vset.pattern.permute.xlu0 %v3989_v0  ;;  %v426_v45 = vld [vmem:[#allocation2 + $0x160] sm:$0xff]  ;;  %v427_v47 = vld [vmem:[#allocation2 + $0x168] sm:$0xff]  ;;  %v3205_v20 = vcombine.high %v385_v14, %v389_v15  ;;  %v392_v22 = vld [vmem:[#allocation2 + $0x50] sm:$0xff]  ;;  %v3204_v23 = vcombine.low %v385_v14, %v389_v15 }
  0x5d   : > { %1646 = vperm.xlu0 %3743, %v4178_v27   ;;  %896 = vmatpush1.bf16.msra.mxu0 %v3214_v32  ;;  %v4198_v50 = vld [vmem:[%s4166_s18 + $0x20] sm:$0xff]  ;;  %v3239_v51 = vcombine.high %v422_v44, %v426_v45  ;;  %v3241_v52 = vcombine.high %v423_v46, %v427_v47  ;;  %v431_v55 = vld [vmem:[#allocation2 + $0x188] sm:$0xff]  ;;  %v3238_v57 = vcombine.low %v422_v44, %v426_v45  ;;  %v396_v24 = vld [vmem:[#allocation2 + $0x70] sm:$0xff] }
  0x5e   : > { %1009 = vmatpush1.bf16.msra.mxu1 %v3216_v33  ;;  %897 = vmatprep.subr.bf16.mxu0 %v3223_v34  ;;  %v430_v53 = vld [vmem:[#allocation2 + $0x180] sm:$0xff]  ;;  %v435_v56 = vld [vmem:[#allocation2 + $0x1a8] sm:$0xff]  ;;  %v3240_v59 = vcombine.low %v423_v46, %v427_v47  ;;  %v393_v25 = vld [vmem:[#allocation2 + $0x58] sm:$0xff]  ;;  %v3211_v30 = vcombine.high %v392_v22, %v396_v24  ;;  %v3210_v33 = vcombine.low %v392_v22, %v396_v24 }
  0x5f   : > { %1010 = vmatprep.subr.bf16.mxu1 %v3225_v35  ;;  %v434_v54 = vld [vmem:[#allocation2 + $0x1a0] sm:$0xff]  ;;  %v4204_v58 = vld [vmem:[%s4166_s18 + $0x28] sm:$0xff]  ;;  %v3249_v61 = vcombine.high %v431_v55, %v435_v56  ;;  %v3248_v7 = vcombine.low %v431_v55, %v435_v56  ;;  %v397_v26 = vld [vmem:[#allocation2 + $0x78] sm:$0xff] }
  0x60   : > { %3742 = vset.pattern.permute.xlu1 %v3990_v1  ;;  %v3247_v60 = vcombine.high %v430_v53, %v434_v54  ;;  %v438_v62 = vld [vmem:[#allocation2 + $0x1c0] sm:$0xff]  ;;  %v439_v3 = vld [vmem:[#allocation2 + $0x1c8] sm:$0xff]  ;;  %v3246_v5 = vcombine.low %v430_v53, %v434_v54  ;;  %v4225_v29 = vld [vmem:[%s4166_s18 + $0x50] sm:$0xff]  ;;  %v3213_v31 = vcombine.high %v393_v25, %v397_v26  ;;  %v3212_v37 = vcombine.low %v393_v25, %v397_v26 }
  0x61   : > { %1490 = vperm.xlu1 %3742, %v4181_v28   ;;  %3744 = vset.pattern.permute.xlu0 %v3990_v1  ;;  %v442_v63 = vld [vmem:[#allocation2 + $0x1e0] sm:$0xff]  ;;  %v443_v4 = vld [vmem:[#allocation2 + $0x1e8] sm:$0xff]  ;;  %v400_v35 = vld [vmem:[#allocation2 + $0x90] sm:$0xff]  ;;  %v3991_v26 = vmov 2  }
  0x62   : > { %1480 = vperm.xlu0 %3744, %v4173_v9   ;;  %898 = vmatpush1.bf16.msra.mxu0 %v3222_v40  ;;  %v3255_v8 = vcombine.high %v438_v62, %v442_v63  ;;  %v3257_v10 = vcombine.high %v439_v3, %v443_v4  ;;  %v3254_v13 = vcombine.low %v438_v62, %v442_v63  ;;  %v4218_v19 = vld [vmem:[%s4191_s28] sm:$0xff]   ;;  %v4231_v32 = vld [vmem:[%s4191_s28 + $0x8] sm:$0xff]   ;;  %v404_v36 = vld [vmem:[#allocation2 + $0xb0] sm:$0xff] }
  0x63   : > { %1011 = vmatpush1.bf16.msra.mxu1 %v3224_v41  ;;  %899 = vmatprep.subr.bf16.mxu0 %v3231_v42  ;;  %v3256_v16 = vcombine.low %v439_v3, %v443_v4  ;;  %v4234_v34 = vld [vmem:[%s4166_s18 + $0x48] sm:$0xff]  ;;  %v401_v38 = vld [vmem:[#allocation2 + $0x98] sm:$0xff]  ;;  %v4241_v40 = vld [vmem:[%s4166_s18 + $0x40] sm:$0xff]  ;;  %v3219_v45 = vcombine.high %v400_v35, %v404_v36  ;;  %v3218_v46 = vcombine.low %v400_v35, %v404_v36 }
  0x64   : > { %1012 = vmatprep.subr.bf16.mxu1 %v3233_v43  ;;  %v405_v39 = vld [vmem:[#allocation2 + $0xb8] sm:$0xff]  ;;  %v408_v41 = vld [vmem:[#allocation2 + $0xd0] sm:$0xff]  ;;  %v4290_v25 = vld [vmem:[%s4166_s18 + $0x60] sm:$0xff] }
  0x65   : > { %3745 = vset.pattern.permute.xlu1 %v3989_v0  ;;  %v412_v42 = vld [vmem:[#allocation2 + $0xf0] sm:$0xff]  ;;  %v409_v43 = vld [vmem:[#allocation2 + $0xd8] sm:$0xff]  ;;  %v3221_v47 = vcombine.high %v401_v38, %v405_v39 }
  0x66   : > { %1650 = vperm.xlu1 %3745, %v4181_v28   ;;  %1485 = vperm.xlu0 %3744, %v4178_v27   ;;  %v413_v44 = vld [vmem:[#allocation2 + $0xf8] sm:$0xff]  ;;  %v416_v54 = vld [vmem:[#allocation2 + $0x110] sm:$0xff] }
  0x67   : > { %900 = vmatpush1.bf16.msra.mxu0 %v3230_v48  ;;  %1013 = vmatpush1.bf16.msra.mxu1 %v3232_v49  ;;  %v3220_v48 = vcombine.low %v401_v38, %v405_v39  ;;  %v4252_v49 = vld [vmem:[%s4191_s28 + $0x10] sm:$0xff]   ;;  %v3229_v53 = vcombine.high %v409_v43, %v413_v44  ;;  %v417_v56 = vld [vmem:[#allocation2 + $0x118] sm:$0xff] }
  0x68   : > { %901 = vmatprep.subr.bf16.mxu0 %v3239_v51  ;;  %1014 = vmatprep.subr.bf16.mxu1 %v3241_v52  ;;  %v4255_v51 = vld [vmem:[%s4166_s18 + $0x68] sm:$0xff]  ;;  %v3227_v52 = vcombine.high %v408_v41, %v412_v42  ;;  %v420_v55 = vld [vmem:[#allocation2 + $0x130] sm:$0xff]  ;;  %v4269_v3 = vld [vmem:[%s4166_s18 + $0x58] sm:$0xff] }
  0x69   : > { %v3235_v62 = vcombine.high %v416_v54, %v420_v55  ;;  %v4273_v4 = vld [vmem:[%s4191_s28 + $0x18] sm:$0xff]   ;;  %v3234_v11 = vcombine.low %v416_v54, %v420_v55  ;;  %v432_v12 = vld [vmem:[#allocation2 + $0x190] sm:$0xff]  ;;  %v3797_v54 = vld [vmem:[#allocation5 + $0xc8] sm:$0xff]  }
  0x6a   : > { %3746 = vset.pattern.permute.xlu1 %v3990_v1  ;;  %1500 = vperm.xlu0 %3744, %v4204_v58   ;;  %v437_v22 = vld [vmem:[#allocation2 + $0x1b8] sm:$0xff]  ;;  %v3800_v55 = vld [vmem:[#allocation5 + $0x10] sm:$0xff]  }
  0x6b   : > { %1495 = vperm.xlu1 %3746, %v4198_v50   ;;  %902 = vmatpush1.bf16.msra.mxu0 %v3238_v57  ;;  %v421_v57 = vld [vmem:[#allocation2 + $0x138] sm:$0xff] }
  0x6c   : > { %1015 = vmatpush1.bf16.msra.mxu1 %v3240_v59  ;;  %903 = vmatprep.subr.bf16.mxu0 %v3247_v60  ;;  %v4261_v59 = vld [vmem:[%s4166_s18 + $0x70] sm:$0xff]  ;;  %v3226_v60 = vcombine.low %v408_v41, %v412_v42  ;;  %v3237_v63 = vcombine.high %v417_v56, %v421_v57  ;;  %v3236_v14 = vcombine.low %v417_v56, %v421_v57  ;;  %v441_v36 = vld [vmem:[#allocation2 + $0x1d8] sm:$0xff]  ;;  %v4301_v41 = vld [vmem:[%s4191_s28 + $0x28] sm:$0xff]  }
  0x6d   : > { %1016 = vmatprep.subr.bf16.mxu1 %v3249_v61  ;;  %v3228_v61 = vcombine.low %v409_v43, %v413_v44  ;;  %v3791_v44 = vld [vmem:[#allocation5 + $0x40] sm:$0xff]   ;;  %v3803_v56 = vld [vmem:[#allocation5 + $0x58] sm:$0xff]   ;;  %v3802_v57 = vld [vmem:[#allocation5 + $0x90] sm:$0xff]  }
  0x6e   : > { %1505 = vperm.xlu0 %3744, %v4209_v6  }
  0x6f   : > { %3747 = vset.pattern.permute.xlu1 %v3989_v0  ;;  %904 = vmatpush1.bf16.msra.mxu0 %v3246_v5  ;;  %v424_v5 = vld [vmem:[#allocation2 + $0x150] sm:$0xff] }
  0x70   : > { %1654 = vperm.xlu1 %3747, %v4198_v50   ;;  %1017 = vmatpush1.bf16.msra.mxu1 %v3248_v7  ;;  %v428_v7 = vld [vmem:[#allocation2 + $0x170] sm:$0xff] }
  0x71   : > { %905 = vmatprep.subr.bf16.mxu0 %v3255_v8  ;;  %1018 = vmatprep.subr.bf16.mxu1 %v3257_v10  ;;  %v425_v8 = vld [vmem:[#allocation2 + $0x158] sm:$0xff]  ;;  %v3243_v15 = vcombine.high %v424_v5, %v428_v7 }
  0x72   : > { %3749 = vset.pattern.permute.xlu0 %v3989_v0  ;;  %v429_v10 = vld [vmem:[#allocation2 + $0x178] sm:$0xff] }
  0x73   : > { %906 = vmatpush1.bf16.msra.mxu0 %v3254_v13  ;;  %1662 = vperm.xlu0 %3749, %v4209_v6   ;;  %v436_v13 = vld [vmem:[#allocation2 + $0x1b0] sm:$0xff] }
  0x74   : > { %1658 = vperm.xlu1 %3747, %v4204_v58   ;;  %1019 = vmatpush1.bf16.msra.mxu1 %v3256_v16  ;;  %v4285_v16 = vld [vmem:[%s4191_s28 + $0x20] sm:$0xff]   ;;  %v3251_v24 = vcombine.high %v432_v12, %v436_v13 }
  0x75   : > { %1117 = vmatprep.subr.bf16.mxu0 %v3203_v17  ;;  %1230 = vmatprep.subr.bf16.mxu1 %v3205_v20  ;;  %v3242_v17 = vcombine.low %v424_v5, %v428_v7  ;;  %v3245_v20 = vcombine.high %v425_v8, %v429_v10  ;;  %v3811_v5 = vld [vmem:[#allocation5 + $0x68] sm:$0xff]  }
  0x76   : > { %924 = vmatmul.mubr.bf16.vlgmr.msra.gmra.mrb[0].mxu0 %v4218_v19  ;;  %v3812_v7 = vld [vmem:[#allocation5 + $0x28] sm:$0xff]  }
  0x77   : > { %1037 = vmatmul.mubr.bf16.vlgmr.msra.gmra.mrb[0].mxu1 %v4218_v19  ;;  %1118 = vmatpush1.bf16.msra.mxu0 %v3202_v21  ;;  %v433_v21 = vld [vmem:[#allocation2 + $0x198] sm:$0xff] }
  0x78   : > { %3748 = vset.pattern.permute.xlu1 %v3990_v1  ;;  %1231 = vmatpush1.bf16.msra.mxu1 %v3204_v23  ;;  %v3244_v23 = vcombine.low %v425_v8, %v429_v10  ;;  %v3253_v35 = vcombine.high %v433_v21, %v437_v22  ;;  %v3252_v38 = vcombine.low %v433_v21, %v437_v22  ;;  %v3813_v8 = vld [vmem:[#allocation5 + $0xe8] sm:$0xff]   ;;  %v3815_v10 = vld [vmem:[#allocation5 + $0x70] sm:$0xff]  }
  0x79   : > { %1510 = vperm.xlu1 %3748, %v4215_v18   ;;  %1678 = vperm.xlu0 %3749, %v4225_v29  }
  0x7a   : > { %933 = vmatprep.mubr.bf16.mxu0 %v3990_v1  ;;  %1046 = vmatprep.mubr.bf16.mxu1 %v3990_v1 }
  0x7b   : > { %1119 = vmatprep.subr.bf16.mxu0 %v3211_v30  ;;  %1232 = vmatprep.subr.bf16.mxu1 %v3213_v31  ;;  %v440_v30 = vld [vmem:[#allocation2 + $0x1d0] sm:$0xff] }
  0x7c   : > { %1120 = vmatpush1.bf16.msra.mxu0 %v3210_v33  ;;  %1233 = vmatpush1.bf16.msra.mxu1 %v3212_v37  ;;  %v444_v31 = vld [vmem:[#allocation2 + $0x1f0] sm:$0xff]  ;;  %v3250_v33 = vcombine.low %v432_v12, %v436_v13  ;;  %v445_v37 = vld [vmem:[#allocation2 + $0x1f8] sm:$0xff] }
  0x7d   : > { %3750 = vset.pattern.permute.xlu1 %v3989_v0  ;;  %3754 = vset.pattern.permute.xlu0 %v3990_v1  ;;  %v3259_v39 = vcombine.high %v440_v30, %v444_v31  ;;  %v3261_v42 = vcombine.high %v441_v36, %v445_v37  ;;  %v3258_v43 = vcombine.low %v440_v30, %v444_v31  ;;  %v3816_v12 = vld [vmem:[#allocation5 + $0x30] sm:$0xff]   ;;  %v3821_v13 = vld [vmem:[#allocation5 + $0xf8] sm:$0xff]  }
  0x7e   : > { %1666 = vperm.xlu1 %3750, %v4215_v18   ;;  %1520 = vperm.xlu0 %3754, %v4234_v34  }
  0x7f   : > { %934 = vmatmul.mubr.bf16.gmra.mrb[4].mxu0 %v4231_v32  ;;  %1047 = vmatmul.mubr.bf16.gmra.mrb[4].mxu1 %v4231_v32 }
  0x80   : > { %943 = vmatprep.mubr.bf16.mxu0 %v3990_v1  ;;  %1056 = vmatprep.mubr.bf16.mxu1 %v3990_v1 }
  0x81   : > { %1121 = vmatprep.subr.bf16.mxu0 %v3219_v45  ;;  %1234 = vmatprep.subr.bf16.mxu1 %v3221_v47  ;;  %v3260_v45 = vcombine.low %v441_v36, %v445_v37  ;;  %v4312_v47 = vld [vmem:[%s4166_s18 + $0x78] sm:$0xff] }
  0x82   : > { %3751 = vset.pattern.permute.xlu1 %v3990_v1  ;;  %1525 = vperm.xlu0 %3754, %v4225_v29  }
  0x83   : > { %1515 = vperm.xlu1 %3751, %v4241_v40   ;;  %1122 = vmatpush1.bf16.msra.mxu0 %v3218_v46  ;;  %v3793_v46 = vld [vmem:[#allocation5 + $0xc0] sm:$0xff]  }
  0x84   : > { %1235 = vmatpush1.bf16.msra.mxu1 %v3220_v48  ;;  %1123 = vmatprep.subr.bf16.mxu0 %v3227_v52  ;;  %v4316_v48 = vld [vmem:[%s4191_s28 + $0x30] sm:$0xff]   ;;  %v3992_v52 = vmov 3  }
  0x85   : > { %1236 = vmatprep.subr.bf16.mxu1 %v3229_v53  ;;  %v4330_v53 = vld [vmem:[%s4191_s28 + $0x38] sm:$0xff]  }
  0x86   : > { %1540 = vperm.xlu0 %3754, %v4255_v51  }
  0x87   : > { %3752 = vset.pattern.permute.xlu1 %v3989_v0  ;;  %944 = vmatmul.mubr.bf16.gmra.mrb[8].mxu0 %v4252_v49 }
  0x88   : > { %1670 = vperm.xlu1 %3752, %v4241_v40   ;;  %1057 = vmatmul.mubr.bf16.gmra.mrb[8].mxu1 %v4252_v49 }
  0x89   : > { %953 = vmatprep.mubr.bf16.mxu0 %v3990_v1  ;;  %1066 = vmatprep.mubr.bf16.mxu1 %v3990_v1 }
  0x8a   : > { %1545 = vperm.xlu0 %3754, %v4261_v59   ;;  %1124 = vmatpush1.bf16.msra.mxu0 %v3226_v60  ;;  %v3805_v60 = vld [vmem:[#allocation5 + $0xd8] sm:$0xff]  }
  0x8b   : > { %1237 = vmatpush1.bf16.msra.mxu1 %v3228_v61  ;;  %1125 = vmatprep.subr.bf16.mxu0 %v3235_v62  ;;  %v3806_v61 = vld [vmem:[#allocation5 + $0x98] sm:$0xff]   ;;  %v3808_v62 = vld [vmem:[#allocation5 + $0x20] sm:$0xff]  }
  0x8c   : > { %1674 = vperm.xlu1 %3752, %v4234_v34   ;;  %1238 = vmatprep.subr.bf16.mxu1 %v3237_v63  ;;  %v3809_v63 = vld [vmem:[#allocation5 + $0xe0] sm:$0xff]  }
  0x8e   : > { %3759 = vset.pattern.permute.xlu0 %v3989_v0  ;;  %1126 = vmatpush1.bf16.msra.mxu0 %v3234_v11 }
  0x8f   : > { %954 = vmatmul.mubr.bf16.gmra.mrb[12].mxu0 %v4273_v4  ;;  %1694 = vperm.xlu0 %3759, %v4261_v59  }
  0x90   : > { %3753 = vset.pattern.permute.xlu1 %v3990_v1  ;;  %1067 = vmatmul.mubr.bf16.gmra.mrb[12].mxu1 %v4273_v4 }
  0x91   : > { %1530 = vperm.xlu1 %3753, %v4269_v3   ;;  %963 = vmatprep.mubr.bf16.mxu0 %v3990_v1 }
  0x92   : > { %1076 = vmatprep.mubr.bf16.mxu1 %v3990_v1  ;;  %1239 = vmatpush1.bf16.msra.mxu1 %v3236_v14  ;;  %v3820_v14 = vld [vmem:[#allocation5 + $0x38] sm:$0xff]  }
  0x93   : > { %3762 = vset.pattern.permute.xlu0 %v3991_v26  ;;  %1127 = vmatprep.subr.bf16.mxu0 %v3243_v15 }
  0x94   : > { %1790 = vperm.xlu0 %3762, %v4173_v9   ;;  %1128 = vmatpush1.bf16.msra.mxu0 %v3242_v17  ;;  %v3822_v17 = vld [vmem:[#allocation5 + $0xb8] sm:$0xff]  }
  0x95   : > { %3755 = vset.pattern.permute.xlu1 %v3989_v0  ;;  %1240 = vmatprep.subr.bf16.mxu1 %v3245_v20  ;;  %v3825_v20 = vld [vmem:[#allocation5 + $0x1c0] sm:$0xff]  }
  0x96   : > { %1682 = vperm.xlu1 %3755, %v4269_v3   ;;  %1241 = vmatpush1.bf16.msra.mxu1 %v3244_v23 }
  0x97   : > { %1129 = vmatprep.subr.bf16.mxu0 %v3251_v24  ;;  %964 = vmatmul.mubr.bf16.gmra.mrb[16].mxu0 %v4285_v16 }
  0x98   : > { %1077 = vmatmul.mubr.bf16.gmra.mrb[16].mxu1 %v4285_v16  ;;  %973 = vmatprep.mubr.bf16.mxu0 %v3990_v1 }
  0x99   : > { %1086 = vmatprep.mubr.bf16.mxu1 %v3990_v1  ;;  %1130 = vmatpush1.bf16.msra.mxu0 %v3250_v33 }
  0x9a   : > { %3756 = vset.pattern.permute.xlu1 %v3990_v1  ;;  %1242 = vmatprep.subr.bf16.mxu1 %v3253_v35 }
  0x9b   : > { %1535 = vperm.xlu1 %3756, %v4290_v25   ;;  %1243 = vmatpush1.bf16.msra.mxu1 %v3252_v38 }
  0x9c   : > { %1794 = vperm.xlu0 %3762, %v4178_v27   ;;  %1131 = vmatprep.subr.bf16.mxu0 %v3259_v39 }
  0x9d   : > { %1244 = vmatprep.subr.bf16.mxu1 %v3261_v42  ;;  %1132 = vmatpush1.bf16.msra.mxu0 %v3258_v43  ;;  %v4462_v43 = vld [vmem:[%s5207_s3] sm:$0xff] }
  0x9e   : > { %3415 = vmatprep.subr.bf16.mxu0 %v3791_v44 }
  0x9f   : > { %3757 = vset.pattern.permute.xlu1 %v3989_v0  ;;  %974 = vmatmul.mubr.bf16.gmra.mrb[20].mxu0 %v4301_v41 }
  0xa0   : > { %1686 = vperm.xlu1 %3757, %v4290_v25   ;;  %1806 = vperm.xlu0 %3762, %v4204_v58  }
  0xa1   : > { %1087 = vmatmul.mubr.bf16.gmra.mrb[20].mxu1 %v4301_v41  ;;  %983 = vmatprep.mubr.bf16.mxu0 %v3990_v1 }
  0xa2   : > { %1096 = vmatprep.mubr.bf16.mxu1 %v3990_v1  ;;  %1245 = vmatpush1.bf16.msra.mxu1 %v3260_v45 }
  0xa3   : > { %3479 = vmatprep.subr.bf16.mxu1 %v3793_v46  ;;  %v447_v46 = vunpack.c.l.bf16 %v4462_v43 }
  0xa4   : > { %1690 = vperm.xlu1 %3757, %v4255_v51   ;;  %3767 = vset.pattern.permute.xlu0 %v3992_v52 }
  0xa5   : > { %1942 = vperm.xlu0 %3767, %v4178_v27   ;;  %v3794_v27 = vld [vmem:[#allocation5 + $0x80] sm:$0xff]  }
  0xa7   : > { %984 = vmatmul.mubr.bf16.gmra.mrb[24].mxu0 %v4316_v48 }
  0xa8   : > { %3758 = vset.pattern.permute.xlu1 %v3990_v1  ;;  %993 = vmatprep.mubr.bf16.mxu0 %v3990_v1 }
  0xa9   : > { %1550 = vperm.xlu1 %3758, %v4312_v47   ;;  %1097 = vmatmul.mubr.bf16.gmra.mrb[24].mxu1 %v4316_v48 }
  0xaa   : > { %1106 = vmatprep.mubr.bf16.mxu1 %v3990_v1  ;;  %1958 = vperm.xlu0 %3767, %v4209_v6  }
  0xad   : > { %3760 = vset.pattern.permute.xlu1 %v3989_v0  ;;  %v3792_v0 = vld [vmem:[#allocation5] sm:$0xff]  }
  0xae   : > { %1698 = vperm.xlu1 %3760, %v4312_v47   ;;  %3770 = vset.pattern.permute.xlu0 %v3991_v26 }
  0xaf   : > { %1810 = vperm.xlu0 %3770, %v4209_v6   ;;  %994 = vmatmul.mubr.bf16.gmra.mrb[28].mxu0 %v4330_v53  ;;  %v3795_v6 = vld [vmem:[#allocation5 + $0x48] sm:$0xff]  }
  0xb0   : > { %1149 = vmatprep.mubr.bf16.mxu0 %v3990_v1 }
  0xb1   : > { %1107 = vmatmul.mubr.bf16.gmra.mrb[28].mxu1 %v4330_v53 }
  0xb2   : > { %3761 = vset.pattern.permute.xlu1 %v3991_v26  ;;  %1262 = vmatprep.mubr.bf16.mxu1 %v3990_v1 }
  0xb3   : > { %1786 = vperm.xlu1 %3761, %v4169_v2   ;;  %1822 = vperm.xlu0 %3770, %v4234_v34  }
  0xb7   : > { %3763 = vset.pattern.permute.xlu1 %v3992_v52  ;;  %1826 = vperm.xlu0 %3770, %v4225_v29  }
  0xb8   : > { %1934 = vperm.xlu1 %3763, %v4169_v2   ;;  %1150 = vmatmul.mubr.bf16.vlgmr.msra.gmra.mrb[32].mxu0 %v4218_v19  ;;  %v3796_v2 = vld [vmem:[#allocation5 + $0x8] sm:$0xff]  }
  0xb9   : > { %1263 = vmatmul.mubr.bf16.vlgmr.msra.gmra.mrb[32].mxu1 %v4218_v19  ;;  %1159 = vmatprep.mubr.bf16.mxu0 %v3990_v1  ;;  %v3798_v19 = vld [vmem:[#allocation5 + $0x88] sm:$0xff]  }
  0xba   : > { %1272 = vmatprep.mubr.bf16.mxu1 %v3990_v1  ;;  %3416 = vmatpush3.bf16.msra.mxu0 %v3792_v0 }
  0xbb   : > { %3775 = vset.pattern.permute.xlu0 %v3992_v52  ;;  %3480 = vmatpush3.bf16.msra.mxu1 %v3794_v27 }
  0xbc   : > { %1938 = vperm.xlu1 %3763, %v4173_v9   ;;  %1974 = vperm.xlu0 %3775, %v4225_v29   ;;  %v3799_v9 = vld [vmem:[#allocation5 + $0x50] sm:$0xff]  }
  0xbd   : > { %3417 = vmatprep.subr.bf16.mxu0 %v3795_v6  ;;  %3481 = vmatprep.subr.bf16.mxu1 %v3797_v54  ;;  %v3801_v29 = vld [vmem:[#allocation5 + $0xd0] sm:$0xff]  }
  0xbe   : > { %3418 = vmatpush3.bf16.msra.mxu0 %v3796_v2 }
  0xbf   : > { %3482 = vmatpush3.bf16.msra.mxu1 %v3798_v19  ;;  %3419 = vmatprep.subr.bf16.mxu0 %v3799_v9 }
  0xc0   : > { %3764 = vset.pattern.permute.xlu1 %v3991_v26  ;;  %1160 = vmatmul.mubr.bf16.gmra.mrb[36].mxu0 %v4231_v32 }
  0xc1   : > { %1798 = vperm.xlu1 %3764, %v4181_v28   ;;  %3778 = vset.pattern.permute.xlu0 %v3991_v26 }
  0xc2   : > { %1273 = vmatmul.mubr.bf16.gmra.mrb[36].mxu1 %v4231_v32  ;;  %1169 = vmatprep.mubr.bf16.mxu0 %v3990_v1  ;;  %v3804_v32 = vld [vmem:[#allocation5 + $0x18] sm:$0xff]  }
  0xc3   : > { %1282 = vmatprep.mubr.bf16.mxu1 %v3990_v1  ;;  %1838 = vperm.xlu0 %3778, %v4255_v51  }
  0xc4   : > { %3420 = vmatpush3.bf16.msra.mxu0 %v3800_v55  ;;  %3483 = vmatprep.subr.bf16.mxu1 %v3801_v29 }
  0xc5   : > { %3765 = vset.pattern.permute.xlu1 %v3992_v52  ;;  %3421 = vmatprep.subr.bf16.mxu0 %v3803_v56 }
  0xc6   : > { %1946 = vperm.xlu1 %3765, %v4181_v28   ;;  %3484 = vmatpush3.bf16.msra.mxu1 %v3802_v57  ;;  %v3807_v28 = vld [vmem:[#allocation5 + $0x60] sm:$0xff]  }
  0xc7   : > { %1842 = vperm.xlu0 %3778, %v4261_v59   ;;  %3485 = vmatprep.subr.bf16.mxu1 %v3805_v60 }
  0xc8   : > { %1170 = vmatmul.mubr.bf16.gmra.mrb[40].mxu0 %v4252_v49 }
  0xc9   : > { %1179 = vmatprep.mubr.bf16.mxu0 %v3990_v1  ;;  %3422 = vmatpush3.bf16.msra.mxu0 %v3804_v32 }
  0xca   : > { %3766 = vset.pattern.permute.xlu1 %v3991_v26  ;;  %1283 = vmatmul.mubr.bf16.gmra.mrb[40].mxu1 %v4252_v49  ;;  %v3810_v49 = vld [vmem:[#allocation5 + $0xa0] sm:$0xff]  }
  0xcb   : > { %1802 = vperm.xlu1 %3766, %v4198_v50   ;;  %1292 = vmatprep.mubr.bf16.mxu1 %v3990_v1 }
  0xcc   : > { %3781 = vset.pattern.permute.xlu0 %v3992_v52  ;;  %3486 = vmatpush3.bf16.msra.mxu1 %v3806_v61 }
  0xcd   : > { %1990 = vperm.xlu0 %3781, %v4261_v59   ;;  %3423 = vmatprep.subr.bf16.mxu0 %v3807_v28  ;;  %v3817_v59 = vld [vmem:[#allocation5 + $0xf0] sm:$0xff]  }
  0xce   : > { %3424 = vmatpush3.bf16.msra.mxu0 %v3808_v62  ;;  %3487 = vmatprep.subr.bf16.mxu1 %v3809_v63 }
  0xcf   : > { %3768 = vset.pattern.permute.xlu1 %v3992_v52  ;;  %3425 = vmatprep.subr.bf16.mxu0 %v3811_v5 }
  0xd0   : > { %1950 = vperm.xlu1 %3768, %v4198_v50   ;;  %1180 = vmatmul.mubr.bf16.gmra.mrb[44].mxu0 %v4273_v4  ;;  %v3814_v50 = vld [vmem:[#allocation5 + $0xa8] sm:$0xff]  }
  0xd1   : > { %1189 = vmatprep.mubr.bf16.mxu0 %v3990_v1  ;;  %3488 = vmatpush3.bf16.msra.mxu1 %v3810_v49 }
  0xd2   : > { %1293 = vmatmul.mubr.bf16.gmra.mrb[44].mxu1 %v4273_v4  ;;  %3426 = vmatpush3.bf16.msra.mxu0 %v3812_v7  ;;  %v3818_v4 = vld [vmem:[#allocation5 + $0xb0] sm:$0xff]  }
  0xd3   : > { %1302 = vmatprep.mubr.bf16.mxu1 %v3990_v1  ;;  %3489 = vmatprep.subr.bf16.mxu1 %v3813_v8 }
  0xd4   : > { %1954 = vperm.xlu1 %3768, %v4204_v58   ;;  %3427 = vmatprep.subr.bf16.mxu0 %v3815_v10  ;;  %v3819_v58 = vld [vmem:[#allocation5 + $0x78] sm:$0xff]  }
  0xd5   : > { %3490 = vmatpush3.bf16.msra.mxu1 %v3814_v50 }
  0xd6   : > { %3491 = vmatprep.subr.bf16.mxu1 %v3817_v59  ;;  %3428 = vmatpush3.bf16.msra.mxu0 %v3816_v12 }
  0xd7   : > { %v4377_v11 = vpop.permute.xlu1 %1638  ;;  %3429 = vmatprep.subr.bf16.mxu0 %v3819_v58  ;;  %v4439_v31 = vpop.permute.xlu0 %1475 }
  0xd8   : > { %5258 = vst [vmem:[#allocation11_spill] sm:$0xff] %v4377_v11  ;;  %3769 = vset.pattern.permute.xlu1 %v3991_v26  ;;  %1190 = vmatmul.mubr.bf16.gmra.mrb[48].mxu0 %v4285_v16  ;;  %5269 = vst [vmem:[#allocation22_spill] sm:$0xff] %v4439_v31 }
  0xd9   : > { %1814 = vperm.xlu1 %3769, %v4215_v18   ;;  %1199 = vmatprep.mubr.bf16.mxu0 %v3990_v1 }
  0xda   : > { %1303 = vmatmul.mubr.bf16.gmra.mrb[48].mxu1 %v4285_v16  ;;  %3430 = vmatpush3.bf16.msra.mxu0 %v3820_v14  ;;  %v3823_v16 = vld [vmem:[#allocation5 + $0x140] sm:$0xff]  }
  0xdb   : > { %1312 = vmatprep.mubr.bf16.mxu1 %v3990_v1  ;;  %v4386_v15 = vpop.permute.xlu1 %1642  ;;  %3492 = vmatpush3.bf16.msra.mxu1 %v3818_v4 }
  0xdc   : > { %5259 = vst [vmem:[#allocation12_spill] sm:$0xff] %v4386_v15  ;;  %3493 = vmatprep.subr.bf16.mxu1 %v3821_v13  ;;  %3543 = vmatprep.subr.bf16.mxu0 %v3823_v16  ;;  %v4443_v33 = vpop.permute.xlu0 %1646 }
  0xdd   : > { %3771 = vset.pattern.permute.xlu1 %v3992_v52 }
  0xde   : > { %1962 = vperm.xlu1 %3771, %v4215_v18  }
  0xdf   : > { %3494 = vmatpush3.bf16.msra.mxu1 %v3822_v17 }
  0xe0   : > { %1200 = vmatmul.mubr.bf16.gmra.mrb[52].mxu0 %v4301_v41  ;;  %v4393_v21 = vpop.permute.xlu1 %1490  ;;  %3607 = vmatprep.subr.bf16.mxu1 %v3825_v20 }
  0xe1   : > { %5260 = vst [vmem:[#allocation13_spill] sm:$0xff] %v4393_v21  ;;  %1209 = vmatprep.mubr.bf16.mxu0 %v3990_v1  ;;  %v4447_v35 = vpop.permute.xlu0 %1480 }
  0xe2   : > { %3772 = vset.pattern.permute.xlu1 %v3991_v26  ;;  %1313 = vmatmul.mubr.bf16.gmra.mrb[52].mxu1 %v4301_v41  ;;  %5272 = vst [vmem:[#allocation25_spill] sm:$0xff] %v4447_v35  ;;  %v451_v41 = vlaneseq }
  0xe3   : > { %1818 = vperm.xlu1 %3772, %v4241_v40   ;;  %1322 = vmatprep.mubr.bf16.mxu1 %v3990_v1 }
  0xe4   : > { %v4464_v44 = vshrl.u32 %v451_v41, 7 }
  0xe5   : > { %v4399_v18 = vpop.permute.xlu1 %1650  ;;  %v4451_v37 = vpop.permute.xlu0 %1485 }
  0xe6   : > { %5261 = vst [vmem:[#allocation14_spill] sm:$0xff] %v4399_v18  ;;  %v5213_v2 = vsub.s32 6, %v4464_v44 }
  0xe7   : > { %3773 = vset.pattern.permute.xlu1 %v3992_v52 }
  0xe8   : > { %1966 = vperm.xlu1 %3773, %v4241_v40   ;;  %1210 = vmatmul.mubr.bf16.gmra.mrb[56].mxu0 %v4316_v48  ;;  %v466_v56 = vrot.slane %v447_v46, %v5213_v2 }
  0xe9   : > { %1219 = vmatprep.mubr.bf16.mxu0 %v3990_v1  ;;  %v4455_v39 = vpop.permute.xlu0 %1500 }
  0xea   : > { %1323 = vmatmul.mubr.bf16.gmra.mrb[56].mxu1 %v4316_v48  ;;  %v4406_v22 = vpop.permute.xlu1 %1495  ;;  %5275 = vst [vmem:[#allocation28_spill] sm:$0xff] %v4455_v39  ;;  %v5214_v48 = vsub.s32 4, %v4464_v44 }
  0xeb   : > { %1332 = vmatprep.mubr.bf16.mxu1 %v3990_v1 }
  0xec   : > { %1970 = vperm.xlu1 %3773, %v4234_v34   ;;  %v462_v6 = vrot.slane %v447_v46, %v5214_v48 }
  0xed   : > { %v4466_v45 = vpop.permute.xlu0 %1505 }
  0xee   : > { %5277 = vst [vmem:[#allocation30_spill] sm:$0xff] %v4466_v45 }
  0xef   : > { %v4413_v40 = vpop.permute.xlu1 %1654 }
  0xf0   : > { %3774 = vset.pattern.permute.xlu1 %v3991_v26  ;;  %1220 = vmatmul.mubr.bf16.gmra.mrb[60].mxu0 %v4330_v53 }
  0xf1   : > { %1830 = vperm.xlu1 %3774, %v4269_v3  }
  0xf2   : > { %1333 = vmatmul.mubr.bf16.gmra.mrb[60].mxu1 %v4330_v53  ;;  %v4476_v53 = vsub.s32 2, %v4464_v44  ;;  %v4479_v27 = vpop.permute.xlu0 %1662 }
  0xf3   : > { %v4418_v1 = vpop.permute.xlu1 %1658 }
  0xf4   : > { %5262 = vst [vmem:[#allocation15_spill] sm:$0xff] %v4418_v1  ;;  %v458_v54 = vrot.slane %v447_v46, %v4476_v53 }
  0xf5   : > { %3776 = vset.pattern.permute.xlu1 %v3992_v52 }
  0xf6   : > { %1978 = vperm.xlu1 %3776, %v4269_v3  }
  0xf8   : > { %v4422_v34 = vpop.permute.xlu1 %1510  ;;  %v4498_v57 = vpop.permute.xlu0 %1678 }
  0xf9   : > { %5263 = vst [vmem:[#allocation16_spill] sm:$0xff] %v4422_v34  ;;  %5279 = vst [vmem:[#allocation32_spill] sm:$0xff] %v4498_v57 }
  0xfa   : > { %3777 = vset.pattern.permute.xlu1 %v3991_v26 }
  0xfb   : > { %1834 = vperm.xlu1 %3777, %v4290_v25  }
  0xfd   : > { %v4425_v23 = vpop.permute.xlu1 %1666 }
  0xfe   : > { %5264 = vst [vmem:[#allocation17_spill] sm:$0xff] %v4425_v23 }
  0xff   : > { %3779 = vset.pattern.permute.xlu1 %v3992_v52 }
 0x100   : > { %1982 = vperm.xlu1 %3779, %v4290_v25  }
 0x102   : > { %v4429_v3 = vpop.permute.xlu1 %1515 }
 0x103   : > { %5265 = vst [vmem:[#allocation18_spill] sm:$0xff] %v4429_v3 }
 0x104   : > { %1986 = vperm.xlu1 %3779, %v4255_v51  }
 0x107   : > { %v4433_v24 = vpop.permute.xlu1 %1670 }
 0x108   : > { %3780 = vset.pattern.permute.xlu1 %v3991_v26  ;;  %5266 = vst [vmem:[#allocation19_spill] sm:$0xff] %v4433_v24 }
 0x109   : > { %1846 = vperm.xlu1 %3780, %v4312_v47  }
 0x10b   : > { %v4435_v30 = vpop.permute.xlu1 %1674 }
 0x10c   : > { %5267 = vst [vmem:[#allocation20_spill] sm:$0xff] %v4435_v30 }
 0x10d   : > { %3782 = vset.pattern.permute.xlu1 %v3992_v52  ;;  %v4473_v52 = vsub.s32 0, %v4464_v44 }
 0x10e   : > { %1994 = vperm.xlu1 %3782, %v4312_v47  }
 0x10f   : > { %v454_v0 = vrot.slane %v447_v46, %v4473_v52  ;;  %v4491_v55 = vrot.slane %v462_v6, %v4473_v52  ;;  %v4494_v29 = vrot.slane %v458_v54, %v4473_v52  ;;  %v4506_v49 = vrot.slane %v466_v56, %v4473_v52 }
 0x110   : > { %v4437_v25 = vpop.permute.xlu1 %1530 }
 0x111   : > { %5268 = vst [vmem:[#allocation21_spill] sm:$0xff] %v4437_v25  ;;  %v4488_v9 = vrot.slane %v454_v0, %v4473_v52  ;;  %v4513_v0 = vpop.permute.xlu0 %1520 }
 0x115   : > { %v4441_v51 = vpop.permute.xlu1 %1682 }
 0x116   : > { %5270 = vst [vmem:[#allocation23_spill] sm:$0xff] %v4441_v51 }
 0x11a   : > { %v4445_v26 = vpop.permute.xlu1 %1535 }
 0x11b   : > { %5271 = vst [vmem:[#allocation24_spill] sm:$0xff] %v4445_v26 }
 0x11f   : > { %v4449_v36 = vpop.permute.xlu1 %1686 }
 0x120   : > { %5273 = vst [vmem:[#allocation26_spill] sm:$0xff] %v4449_v36 }
 0x123   : > { %v4453_v38 = vpop.permute.xlu1 %1690 }
 0x124   : > { %5274 = vst [vmem:[#allocation27_spill] sm:$0xff] %v4453_v38 }
 0x128   : > { %v4457_v42 = vpop.permute.xlu1 %1550 }
 0x129   : > { %5276 = vst [vmem:[#allocation29_spill] sm:$0xff] %v4457_v42 }
 0x12d   : > { %v4469_v47 = vpop.permute.xlu1 %1698 }
 0x12e   : > { %5278 = vst [vmem:[#allocation31_spill] sm:$0xff] %v4469_v47 }
 0x132   : > { %v4485_v19 = vpop.permute.xlu1 %1786 }
 0x137   : > { %v4501_v62 = vpop.permute.xlu1 %1934 }
 0x13b   : > { %v4516_v56 = vpop.permute.xlu1 %1938 }
 0x13c   : > { %5280 = vst [vmem:[#allocation33_spill] sm:$0xff] %v4516_v56 }
 0x149   : > { %v925_v32 = vpop.f32.mrb[0].mxu0 }
 0x14a   : > { %v926_v60 = vadd.f32 %v925_v32, %v4488_v9  ;;  %v1038_v61 = vpop.f32.mrb[0].mxu1  ;;  %v927_v28 = vpop.f32.mrb[1].mxu0 }
 0x14b   : > { %v1039_v63 = vadd.f32 %v1038_v61, %v4491_v55  ;;  %v928_v5 = vadd.f32 %v927_v28, %v4494_v29  ;;  %v1040_v7 = vpop.f32.mrb[1].mxu1  ;;  %v929_v10 = vpop.f32.mrb[2].mxu0 }
 0x14c   : > { %v1343_v8 = vmax.f32 %v926_v60, 0.0  ;;  %v1042_v50 = vpop.f32.mrb[2].mxu1  ;;  %v930_v12 = vadd.f32 %v929_v10, %v4488_v9  ;;  %v931_v58 = vpop.f32.mrb[3].mxu0  ;;  %v1041_v20 = vadd.f32 %v1040_v7, %v4506_v49 }
 0x14d   : > { %v1345_v59 = vmax.f32 %v1039_v63, 0.0  ;;  %v1043_v4 = vadd.f32 %v1042_v50, %v4491_v55  ;;  %v1044_v13 = vpop.f32.mrb[3].mxu1  ;;  %v1344_v14 = vmax.f32 %v928_v5, 0.0  ;;  %v932_v17 = vadd.f32 %v931_v58, %v4494_v29 }
 0x14e   : > { %v1045_v16 = vadd.f32 %v1044_v13, %v4506_v49  ;;  %v1351_v41 = vmax.f32 %v930_v12, 0.0  ;;  %v1553_v6 = vmul.f32 %v4439_v31, %v1343_v8  ;;  %v1346_v12 = vmax.f32 %v1041_v20, 0.0 }
 0x14f   : > { %v1353_v46 = vmax.f32 %v1043_v4, 0.0  ;;  %v1352_v54 = vmax.f32 %v932_v17, 0.0  ;;  %v4519_v32 = vmul.f32 %v4377_v11, %v1345_v59  ;;  %v1554_v5 = vmul.f32 %v4439_v31, %v1344_v14 }
 0x150   : > { %v1555_v60 = vmul.f32 %v4447_v35, %v1351_v41  ;;  %v1354_v28 = vmax.f32 %v1045_v16, 0.0 }
 0x151   : > { %v4523_v61 = vmul.f32 %v4386_v15, %v1353_v46  ;;  %v1556_v7 = vmul.f32 %v4447_v35, %v1352_v54  ;;  %v3824_v54 = vld [vmem:[#allocation5 + $0x100] sm:$0xff]   ;;  %v4536_v35 = vpop.permute.xlu1 %1798 }
 0x152   : > { %v935_v63 = vpop.f32.mrb[4].mxu0  ;;  %v1048_v8 = vpop.f32.mrb[4].mxu1  ;;  %v1585_v4 = vpack.c.bf16 %v1555_v60, %v1553_v6  ;;  %5281 = vst [vmem:[#allocation34_spill] sm:$0xff] %v4536_v35 }
 0x153   : > { %v936_v10 = vadd.f32 %v935_v63, %v4488_v9  ;;  %v937_v50 = vpop.f32.mrb[5].mxu0  ;;  %v1733_v59 = vpack.c.bf16 %v4523_v61, %v4519_v32  ;;  %v1049_v58 = vadd.f32 %v1048_v8, %v4491_v55  ;;  %v1050_v13 = vpop.f32.mrb[5].mxu1  ;;  %v1586_v46 = vpack.c.bf16 %v1556_v7, %v1554_v5  ;;  %v3827_v32 = vld [vmem:[#allocation5 + $0x148] sm:$0xff]  }
 0x154   : > { %v939_v17 = vpop.f32.mrb[6].mxu0  ;;  %v938_v16 = vadd.f32 %v937_v50, %v4494_v29  ;;  %v1052_v14 = vpop.f32.mrb[6].mxu1  ;;  %v1704_v63 = vmul.f32 %v4386_v15, %v1354_v28  ;;  %v1702_v50 = vmul.f32 %v4377_v11, %v1346_v12  ;;  %v1051_v5 = vadd.f32 %v1050_v13, %v4506_v49  ;;  %v3829_v15 = vld [vmem:[#allocation5 + $0x1c8] sm:$0xff]  }
 0x155   : > { %v940_v41 = vadd.f32 %v939_v17, %v4488_v9  ;;  %v1359_v2 = vmax.f32 %v936_v10, 0.0  ;;  %v1361_v48 = vmax.f32 %v1049_v58, 0.0  ;;  %v1053_v20 = vadd.f32 %v1052_v14, %v4491_v55  ;;  %v941_v6 = vpop.f32.mrb[7].mxu0  ;;  %v1054_v60 = vpop.f32.mrb[7].mxu1  ;;  %2625 = vmatprep.mubr.bf16.mxu0 %v1586_v46 }
 0x156   : > { %v942_v8 = vadd.f32 %v941_v6, %v4494_v29  ;;  %2626 = vmatmul.mubr.bf16.vlgmr.msra.gmra.mrb[64].mxu0 %v1585_v4  ;;  %v1360_v28 = vmax.f32 %v938_v16, 0.0  ;;  %v1055_v17 = vadd.f32 %v1054_v60, %v4506_v49  ;;  %v4544_v14 = vpop.permute.xlu0 %1525  ;;  %v1734_v4 = vpack.c.bf16 %v1704_v63, %v1702_v50  ;;  %v3831_v6 = vld [vmem:[#allocation5 + $0x150] sm:$0xff]   ;;  %v4564_v35 = vpop.permute.xlu1 %1946 }
 0x157   : > { %v1367_v61 = vmax.f32 %v940_v41, 0.0  ;;  %v1369_v7 = vmax.f32 %v1053_v20, 0.0  ;;  %3544 = vmatpush3.bf16.msra.mxu0 %v3824_v54  ;;  %v3828_v41 = vld [vmem:[#allocation5 + $0x108] sm:$0xff]   ;;  %5282 = vst [vmem:[#allocation35_spill] sm:$0xff] %v4544_v14  ;;  %v4547_v46 = vmul.f32 %v4451_v37, %v1359_v2  ;;  %v4550_v12 = vmul.f32 %v4443_v33, %v1361_v48  ;;  %v3826_v20 = vld [vmem:[#allocation5 + $0x180] sm:$0xff]  }
 0x158   : > { %v1368_v58 = vmax.f32 %v942_v8, 0.0  ;;  %3545 = vmatprep.subr.bf16.mxu0 %v3827_v32  ;;  %v1362_v31 = vmax.f32 %v1051_v5, 0.0  ;;  %2722 = vmatprep.mubr.bf16.mxu1 %v1734_v4  ;;  %v1558_v32 = vmul.f32 %v4451_v37, %v1360_v28 }
 0x159   : > { %v4541_v10 = vmul.f32 %v4393_v21, %v1367_v61  ;;  %v4553_v13 = vmul.f32 %v4399_v18, %v1369_v7  ;;  %v1370_v61 = vmax.f32 %v1055_v17, 0.0  ;;  %2723 = vmatmul.mubr.bf16.vlgmr.msra.gmra.mrb[64].mxu1 %v1733_v59 }
 0x15a   : > { %v945_v16 = vpop.f32.mrb[8].mxu0  ;;  %v1560_v50 = vmul.f32 %v4393_v21, %v1368_v58  ;;  %3608 = vmatpush3.bf16.msra.mxu1 %v3826_v20 }
 0x15b   : > { %v946_v54 = vadd.f32 %v945_v16, %v4488_v9  ;;  %v1058_v60 = vpop.f32.mrb[8].mxu1  ;;  %v947_v8 = vpop.f32.mrb[9].mxu0  ;;  %v1587_v7 = vpack.c.bf16 %v4541_v10, %v4547_v46  ;;  %v1735_v63 = vpack.c.bf16 %v4553_v13, %v4550_v12  ;;  %3546 = vmatpush3.bf16.msra.mxu0 %v3828_v41  ;;  %v1708_v56 = vmul.f32 %v4399_v18, %v1370_v61  ;;  %v3830_v12 = vld [vmem:[#allocation5 + $0x188] sm:$0xff]   ;;  %v3833_v41 = vld [vmem:[#allocation5 + $0x1d0] sm:$0xff]  }
 0x15c   : > { %v948_v2 = vadd.f32 %v947_v8, %v4494_v29  ;;  %v1060_v48 = vpop.f32.mrb[9].mxu1  ;;  %v949_v11 = vpop.f32.mrb[10].mxu0  ;;  %v3832_v8 = vld [vmem:[#allocation5 + $0x110] sm:$0xff]   ;;  %3547 = vmatprep.subr.bf16.mxu0 %v3831_v6  ;;  %3609 = vmatprep.subr.bf16.mxu1 %v3829_v15  ;;  %v1059_v61 = vadd.f32 %v1058_v60, %v4491_v55 }
 0x15d   : > { %v1375_v17 = vmax.f32 %v946_v54, 0.0  ;;  %v950_v16 = vadd.f32 %v949_v11, %v4488_v9  ;;  %v1062_v5 = vpop.f32.mrb[10].mxu1  ;;  %v951_v4 = vpop.f32.mrb[11].mxu0  ;;  %v1061_v58 = vadd.f32 %v1060_v48, %v4506_v49  ;;  %v1706_v54 = vmul.f32 %v4443_v33, %v1362_v31  ;;  %v3835_v48 = vld [vmem:[#allocation5 + $0x158] sm:$0xff]   ;;  %v3834_v60 = vld [vmem:[#allocation5 + $0x190] sm:$0xff]  }
 0x15e   : > { %v1063_v10 = vadd.f32 %v1062_v5, %v4491_v55  ;;  %v952_v46 = vadd.f32 %v951_v4, %v4494_v29  ;;  %v1064_v28 = vpop.f32.mrb[11].mxu1  ;;  %v1376_v59 = vmax.f32 %v948_v2, 0.0  ;;  %v1588_v2 = vpack.c.bf16 %v1560_v50, %v1558_v32  ;;  %3610 = vmatpush3.bf16.msra.mxu1 %v3830_v12 }
 0x15f   : > { %v1383_v11 = vmax.f32 %v950_v16, 0.0  ;;  %v1065_v13 = vadd.f32 %v1064_v28, %v4506_v49  ;;  %v4574_v5 = vmul.f32 %v4406_v22, %v1375_v17  ;;  %3548 = vmatpush3.bf16.msra.mxu0 %v3832_v8  ;;  %v4579_v16 = vpop.permute.xlu0 %1540  ;;  %v1736_v18 = vpack.c.bf16 %v1708_v56, %v1706_v54  ;;  %3611 = vmatprep.subr.bf16.mxu1 %v3833_v41  ;;  %v3837_v8 = vld [vmem:[#allocation5 + $0x1d8] sm:$0xff]   ;;  %v3839_v54 = vld [vmem:[#allocation5 + $0x160] sm:$0xff]  }
 0x160   : > { %v1384_v20 = vmax.f32 %v952_v46, 0.0  ;;  %5283 = vst [vmem:[#allocation36_spill] sm:$0xff] %v4579_v16  ;;  %v1385_v28 = vmax.f32 %v1063_v10, 0.0  ;;  %v3836_v46 = vld [vmem:[#allocation5 + $0x118] sm:$0xff]   ;;  %v1562_v17 = vmul.f32 %v4406_v22, %v1376_v59  ;;  %v1378_v21 = vmax.f32 %v1061_v58, 0.0  ;;  %2633 = vmatprep.mubr.bf16.mxu0 %v1588_v2  ;;  %v4586_v10 = vpop.permute.xlu1 %1802  ;;  %3549 = vmatprep.subr.bf16.mxu0 %v3835_v48  ;;  %v3840_v48 = vld [vmem:[#allocation5 + $0x120] sm:$0xff]  }
 0x161   : > { %v4577_v4 = vmul.f32 %v4455_v39, %v1383_v11  ;;  %v1386_v6 = vmax.f32 %v1065_v13, 0.0  ;;  %v1377_v56 = vmax.f32 %v1059_v61, 0.0  ;;  %2730 = vmatprep.mubr.bf16.mxu1 %v1736_v18  ;;  %2634 = vmatmul.mubr.bf16.gmra.mrb[68].mxu0 %v1587_v7 }
 0x162   : > { %v1564_v15 = vmul.f32 %v4455_v39, %v1384_v20  ;;  %v955_v31 = vpop.f32.mrb[12].mxu0  ;;  %2731 = vmatmul.mubr.bf16.gmra.mrb[68].mxu1 %v1735_v63  ;;  %v1711_v18 = vmul.f32 %v4418_v1, %v1385_v28  ;;  %v3838_v63 = vld [vmem:[#allocation5 + $0x198] sm:$0xff]  }
 0x163   : > { %v956_v11 = vadd.f32 %v955_v31, %v4488_v9  ;;  %v1068_v13 = vpop.f32.mrb[12].mxu1  ;;  %v957_v32 = vpop.f32.mrb[13].mxu0  ;;  %v1589_v50 = vpack.c.bf16 %v4577_v4, %v4574_v5  ;;  %v1712_v20 = vmul.f32 %v4418_v1, %v1386_v6  ;;  %3612 = vmatpush3.bf16.msra.mxu1 %v3834_v60  ;;  %3550 = vmatpush3.bf16.msra.mxu0 %v3836_v46 }
 0x164   : > { %v1069_v12 = vadd.f32 %v1068_v13, %v4491_v55  ;;  %v958_v59 = vadd.f32 %v957_v32, %v4494_v29  ;;  %v1070_v58 = vpop.f32.mrb[13].mxu1  ;;  %v959_v41 = vpop.f32.mrb[14].mxu0  ;;  %v1590_v4 = vpack.c.bf16 %v1564_v15, %v1562_v17  ;;  %v1710_v6 = vmul.f32 %v4413_v40, %v1378_v21  ;;  %3613 = vmatprep.subr.bf16.mxu1 %v3837_v8 }
 0x165   : > { %v1391_v2 = vmax.f32 %v956_v11, 0.0  ;;  %v4592_v31 = vadd.f32 %v1070_v58, %v4506_v49  ;;  %v1072_v5 = vpop.f32.mrb[14].mxu1  ;;  %v960_v61 = vadd.f32 %v959_v41, %v4488_v9  ;;  %v961_v32 = vpop.f32.mrb[15].mxu0  ;;  %v1709_v28 = vmul.f32 %v4413_v40, %v1377_v56  ;;  %3551 = vmatprep.subr.bf16.mxu0 %v3839_v54 }
 0x166   : > { %v1393_v7 = vmax.f32 %v1069_v12, 0.0  ;;  %v1073_v13 = vadd.f32 %v1072_v5, %v4491_v55  ;;  %v1074_v39 = vpop.f32.mrb[15].mxu1  ;;  %v1392_v11 = vmax.f32 %v958_v59, 0.0  ;;  %v962_v58 = vadd.f32 %v961_v32, %v4494_v29  ;;  %2641 = vmatprep.mubr.bf16.mxu0 %v1590_v4  ;;  %v4604_v60 = vpop.permute.xlu0 %1545  ;;  %v3841_v5 = vld [vmem:[#allocation5 + $0x1e0] sm:$0xff]  }
 0x167   : > { %v1075_v15 = vadd.f32 %v1074_v39, %v4506_v49  ;;  %v1399_v12 = vmax.f32 %v960_v61, 0.0  ;;  %5284 = vst [vmem:[#allocation37_spill] sm:$0xff] %v4604_v60  ;;  %v4607_v21 = vmul.f32 %v4466_v45, %v1391_v2  ;;  %v1394_v46 = vmax.f32 %v4592_v31, 0.0  ;;  %v4610_v8 = vpop.permute.xlu1 %1950  ;;  %3614 = vmatpush3.bf16.msra.mxu1 %v3838_v63  ;;  %v3843_v2 = vld [vmem:[#allocation5 + $0x168] sm:$0xff]   ;;  %3552 = vmatpush3.bf16.msra.mxu0 %v3840_v48 }
 0x168   : > { %v4602_v17 = vmul.f32 %v4479_v27, %v1393_v7  ;;  %v1401_v41 = vmax.f32 %v1073_v13, 0.0  ;;  %v1400_v59 = vmax.f32 %v962_v58, 0.0  ;;  %v1738_v39 = vpack.c.bf16 %v1712_v20, %v1710_v6  ;;  %v3842_v13 = vld [vmem:[#allocation5 + $0x1a0] sm:$0xff]   ;;  %3615 = vmatprep.subr.bf16.mxu1 %v3841_v5  ;;  %3553 = vmatprep.subr.bf16.mxu0 %v3843_v2 }
 0x169   : > { %v4613_v56 = vmul.f32 %v4422_v34, %v1399_v12  ;;  %v1402_v7 = vmax.f32 %v1075_v15, 0.0  ;;  %v1737_v54 = vpack.c.bf16 %v1711_v18, %v1709_v28  ;;  %v1566_v32 = vmul.f32 %v4466_v45, %v1392_v11  ;;  %v3844_v12 = vld [vmem:[#allocation5 + $0x128] sm:$0xff]   ;;  %2642 = vmatmul.mubr.bf16.gmra.mrb[72].mxu0 %v1589_v50  ;;  %v3847_v11 = vld [vmem:[#allocation5 + $0x170] sm:$0xff]  }
 0x16a   : > { %v4616_v4 = vmul.f32 %v4425_v23, %v1401_v41  ;;  %v965_v61 = vpop.f32.mrb[16].mxu0  ;;  %v1568_v31 = vmul.f32 %v4422_v34, %v1400_v59  ;;  %2738 = vmatprep.mubr.bf16.mxu1 %v1738_v39  ;;  %v3845_v15 = vld [vmem:[#allocation5 + $0x1e8] sm:$0xff]   ;;  %v1714_v50 = vmul.f32 %v4479_v27, %v1394_v46  ;;  %v4632_v5 = vunpack.c.h.bf16 %v4462_v43 }
 0x16b   : > { %v966_v20 = vadd.f32 %v965_v61, %v4488_v9  ;;  %v1078_v6 = vpop.f32.mrb[16].mxu1  ;;  %v967_v58 = vpop.f32.mrb[17].mxu0  ;;  %v1591_v18 = vpack.c.bf16 %v4613_v56, %v4607_v21  ;;  %2739 = vmatmul.mubr.bf16.gmra.mrb[72].mxu1 %v1737_v54  ;;  %v1716_v48 = vmul.f32 %v4425_v23, %v1402_v7  ;;  %3554 = vmatpush3.bf16.msra.mxu0 %v3844_v12 }
 0x16c   : > { %v1080_v41 = vpop.f32.mrb[17].mxu1  ;;  %v969_v1 = vpop.f32.mrb[18].mxu0  ;;  %v1739_v63 = vpack.c.bf16 %v4616_v4, %v4602_v17  ;;  %v968_v28 = vadd.f32 %v967_v58, %v4494_v29  ;;  %v1592_v61 = vpack.c.bf16 %v1568_v31, %v1566_v32  ;;  %3616 = vmatpush3.bf16.msra.mxu1 %v3842_v13  ;;  %v3846_v17 = vld [vmem:[#allocation5 + $0x1a8] sm:$0xff]   ;;  %v3849_v32 = vld [vmem:[#allocation5 + $0x1f0] sm:$0xff]   ;;  %v1079_v7 = vadd.f32 %v1078_v6, %v4491_v55  ;;  %v3851_v58 = vld [vmem:[#allocation5 + $0x178] sm:$0xff]  }
 0x16d   : > { %v970_v59 = vadd.f32 %v969_v1, %v4488_v9  ;;  %v1082_v39 = vpop.f32.mrb[18].mxu1  ;;  %v1407_v34 = vmax.f32 %v966_v20, 0.0  ;;  %v971_v45 = vpop.f32.mrb[19].mxu0  ;;  %v3848_v1 = vld [vmem:[#allocation5 + $0x130] sm:$0xff]   ;;  %v1081_v13 = vadd.f32 %v1080_v41, %v4506_v49  ;;  %3617 = vmatprep.subr.bf16.mxu1 %v3845_v15  ;;  %3555 = vmatprep.subr.bf16.mxu0 %v3847_v11 }
 0x16e   : > { %v1084_v21 = vpop.f32.mrb[19].mxu1  ;;  %v1083_v4 = vadd.f32 %v1082_v39, %v4491_v55  ;;  %v972_v54 = vadd.f32 %v971_v45, %v4494_v29  ;;  %2649 = vmatprep.mubr.bf16.mxu0 %v1592_v61  ;;  %v4634_v46 = vpop.permute.xlu1 %1954  ;;  %v1408_v2 = vmax.f32 %v968_v28, 0.0  ;;  %v3850_v6 = vld [vmem:[#allocation5 + $0x1b0] sm:$0xff]   ;;  %v1409_v23 = vmax.f32 %v1079_v7, 0.0 }
 0x16f   : > { %v1415_v56 = vmax.f32 %v970_v59, 0.0  ;;  %v1085_v20 = vadd.f32 %v1084_v21, %v4506_v49  ;;  %v4642_v12 = vpop.permute.xlu0 %1694  ;;  %v4645_v43 = vmul.f32 %v4429_v3, %v1407_v34  ;;  %v1740_v59 = vpack.c.bf16 %v1716_v48, %v1714_v50  ;;  %3556 = vmatpush3.bf16.msra.mxu0 %v3848_v1 }
 0x170   : > { %v1416_v45 = vmax.f32 %v972_v54, 0.0  ;;  %5285 = vst [vmem:[#allocation38_spill] sm:$0xff] %v4642_v12  ;;  %3618 = vmatpush3.bf16.msra.mxu1 %v3846_v17  ;;  %v1417_v41 = vmax.f32 %v1083_v4, 0.0  ;;  %v3853_v54 = vld [vmem:[#allocation5 + $0x1f8] sm:$0xff]   ;;  %v1410_v34 = vmax.f32 %v1081_v13, 0.0  ;;  %3557 = vmatprep.subr.bf16.mxu0 %v3851_v58  ;;  %v1717_v58 = vmul.f32 %v4433_v24, %v1409_v23 }
 0x171   : > { %v4639_v31 = vmul.f32 %v4513_v0, %v1415_v56  ;;  %v1418_v15 = vmax.f32 %v1085_v20, 0.0  ;;  %3619 = vmatprep.subr.bf16.mxu1 %v3849_v32  ;;  %v3852_v56 = vld [vmem:[#allocation5 + $0x138] sm:$0xff]   ;;  %2746 = vmatprep.mubr.bf16.mxu1 %v1740_v59  ;;  %v1570_v20 = vmul.f32 %v4429_v3, %v1408_v2 }
 0x172   : > { %v975_v39 = vpop.f32.mrb[20].mxu0  ;;  %2650 = vmatmul.mubr.bf16.gmra.mrb[76].mxu0 %v1591_v18  ;;  %v1572_v1 = vmul.f32 %v4513_v0, %v1416_v45  ;;  %v4656_v13 = vpop.permute.xlu1 %1814  ;;  %v3854_v45 = vld [vmem:[#allocation5 + $0x1b8] sm:$0xff]  }
 0x173   : > { %v976_v11 = vadd.f32 %v975_v39, %v4488_v9  ;;  %v977_v61 = vpop.f32.mrb[21].mxu0  ;;  %v1593_v4 = vpack.c.bf16 %v4639_v31, %v4645_v43  ;;  %2747 = vmatmul.mubr.bf16.gmra.mrb[76].mxu1 %v1739_v63  ;;  %v1720_v18 = vmul.f32 %v4435_v30, %v1418_v15  ;;  %v1719_v63 = vmul.f32 %v4435_v30, %v1417_v41 }
 0x174   : > { %v1088_v28 = vpop.f32.mrb[20].mxu1  ;;  %v978_v50 = vadd.f32 %v977_v61, %v4494_v29  ;;  %v979_v17 = vpop.f32.mrb[22].mxu0  ;;  %3620 = vmatpush3.bf16.msra.mxu1 %v3850_v6  ;;  %3558 = vmatpush3.bf16.msra.mxu0 %v3852_v56  ;;  %v1718_v15 = vmul.f32 %v4433_v24, %v1410_v34 }
 0x175   : > { %v1090_v48 = vpop.f32.mrb[21].mxu1  ;;  %v1423_v32 = vmax.f32 %v976_v11, 0.0  ;;  %v980_v39 = vadd.f32 %v979_v17, %v4488_v9  ;;  %v981_v7 = vpop.f32.mrb[23].mxu0  ;;  %3621 = vmatprep.subr.bf16.mxu1 %v3853_v54  ;;  %v1741_v34 = vpack.c.bf16 %v1719_v63, %v1717_v58 }
 0x176   : > { %v1092_v21 = vpop.f32.mrb[22].mxu1  ;;  %v1091_v59 = vadd.f32 %v1090_v48, %v4506_v49  ;;  %v982_v31 = vadd.f32 %v981_v7, %v4494_v29  ;;  %v1424_v43 = vmax.f32 %v978_v50, 0.0  ;;  %v1089_v48 = vadd.f32 %v1088_v28, %v4491_v55 }
 0x177   : > { %v1093_v61 = vadd.f32 %v1092_v21, %v4491_v55  ;;  %v1094_v2 = vpop.f32.mrb[23].mxu1  ;;  %v1431_v11 = vmax.f32 %v980_v39, 0.0  ;;  %v4668_v7 = vmul.f32 %v4544_v14, %v1423_v32  ;;  %v1594_v50 = vpack.c.bf16 %v1572_v1, %v1570_v20  ;;  %v4673_v39 = vpop.permute.xlu0 %1790 }
 0x178   : > { %v1095_v17 = vadd.f32 %v1094_v2, %v4506_v49  ;;  %v1432_v21 = vmax.f32 %v982_v31, 0.0  ;;  %v1426_v2 = vmax.f32 %v1091_v59, 0.0  ;;  %v1742_v23 = vpack.c.bf16 %v1720_v18, %v1718_v15  ;;  %3622 = vmatpush3.bf16.msra.mxu1 %v3854_v45  ;;  %v4680_v1 = vpop.permute.xlu1 %1962 }
 0x179   : > { %v4671_v6 = vmul.f32 %v4437_v25, %v1431_v11  ;;  %v1433_v56 = vmax.f32 %v1093_v61, 0.0  ;;  %v1574_v28 = vmul.f32 %v4544_v14, %v1424_v43  ;;  %2657 = vmatprep.mubr.bf16.mxu0 %v1594_v50  ;;  %v1425_v59 = vmax.f32 %v1089_v48, 0.0 }
 0x17a   : > { %v1434_v41 = vmax.f32 %v1095_v17, 0.0  ;;  %v1576_v54 = vmul.f32 %v4437_v25, %v1432_v21  ;;  %v985_v30 = vpop.f32.mrb[24].mxu0  ;;  %2754 = vmatprep.mubr.bf16.mxu1 %v1742_v23  ;;  %2658 = vmatmul.mubr.bf16.gmra.mrb[80].mxu0 %v1593_v4  ;;  %v5286_v43 = vsub.s32 4, %v4464_v44  ;;  %v474_v4 = vrot.slane %v4632_v5, %v4476_v53 }
 0x17b   : > { %v986_v32 = vadd.f32 %v985_v30, %v4488_v9  ;;  %v987_v11 = vpop.f32.mrb[25].mxu0  ;;  %v1595_v20 = vpack.c.bf16 %v4671_v6, %v4668_v7  ;;  %2755 = vmatmul.mubr.bf16.gmra.mrb[80].mxu1 %v1741_v34  ;;  %v1723_v48 = vmul.f32 %v4441_v51, %v1433_v56 }
 0x17c   : > { %v1098_v31 = vpop.f32.mrb[24].mxu1  ;;  %v988_v61 = vadd.f32 %v987_v11, %v4494_v29  ;;  %v4687_v63 = vrot.slane %v4632_v5, %v5286_v43  ;;  %v1724_v30 = vmul.f32 %v4441_v51, %v1434_v41  ;;  %v989_v58 = vpop.f32.mrb[26].mxu0  ;;  %v1596_v21 = vpack.c.bf16 %v1576_v54, %v1574_v28 }
 0x17d   : > { %v1099_v18 = vadd.f32 %v1098_v31, %v4491_v55  ;;  %v1100_v45 = vpop.f32.mrb[25].mxu1  ;;  %v1439_v17 = vmax.f32 %v986_v32, 0.0  ;;  %v990_v6 = vadd.f32 %v989_v58, %v4488_v9  ;;  %v991_v23 = vpop.f32.mrb[27].mxu0  ;;  %v1722_v41 = vmul.f32 %v4498_v57, %v1426_v2 }
 0x17e   : > { %v1102_v15 = vpop.f32.mrb[26].mxu1  ;;  %v4695_v11 = vpop.permute.xlu0 %1794  ;;  %v1440_v34 = vmax.f32 %v988_v61, 0.0  ;;  %v992_v32 = vadd.f32 %v991_v23, %v4494_v29  ;;  %2665 = vmatprep.mubr.bf16.mxu0 %v1596_v21  ;;  %v1721_v28 = vmul.f32 %v4498_v57, %v1425_v59  ;;  %v1101_v56 = vadd.f32 %v1100_v45, %v4506_v49 }
 0x17f   : > { %v1441_v7 = vmax.f32 %v1099_v18, 0.0  ;;  %v1103_v50 = vadd.f32 %v1102_v15, %v4491_v55  ;;  %v1104_v31 = vpop.f32.mrb[27].mxu1  ;;  %v1447_v18 = vmax.f32 %v990_v6, 0.0  ;;  %v4703_v58 = vmul.f32 %v4445_v26, %v1439_v17  ;;  %v4708_v61 = vpop.permute.xlu1 %1818 }
 0x180   : > { %v1105_v54 = vadd.f32 %v1104_v31, %v4506_v49  ;;  %v1448_v51 = vmax.f32 %v992_v32, 0.0  ;;  %v1744_v2 = vpack.c.bf16 %v1724_v30, %v1722_v41  ;;  %v1743_v31 = vpack.c.bf16 %v1723_v48, %v1721_v28 }
 0x181   : > { %v1449_v43 = vmax.f32 %v1103_v50, 0.0  ;;  %v4706_v15 = vmul.f32 %v4449_v36, %v1441_v7  ;;  %v1579_v23 = vmul.f32 %v4579_v16, %v1447_v18  ;;  %v1578_v6 = vmul.f32 %v4445_v26, %v1440_v34 }
 0x182   : > { %v1450_v59 = vmax.f32 %v1105_v54, 0.0  ;;  %v995_v45 = vpop.f32.mrb[28].mxu0  ;;  %v1580_v17 = vmul.f32 %v4579_v16, %v1448_v51  ;;  %2762 = vmatprep.mubr.bf16.mxu1 %v1744_v2  ;;  %v5287_v30 = vsub.s32 6, %v4464_v44  ;;  %v1442_v18 = vmax.f32 %v1101_v56, 0.0  ;;  %2666 = vmatmul.mubr.bf16.gmra.mrb[84].mxu0 %v1595_v20  ;;  %v4724_v34 = vpop.permute.xlu0 %1806 }
 0x183   : > { %v4712_v21 = vmul.f32 %v4453_v38, %v1449_v43  ;;  %v996_v7 = vadd.f32 %v995_v45, %v4488_v9  ;;  %v997_v32 = vpop.f32.mrb[29].mxu0  ;;  %v1597_v28 = vpack.c.bf16 %v1579_v23, %v4703_v58  ;;  %2763 = vmatmul.mubr.bf16.gmra.mrb[84].mxu1 %v1743_v31  ;;  %v5288_v20 = vrot.slane %v4632_v5, %v4473_v52 }
 0x184   : > { %v1108_v50 = vpop.f32.mrb[28].mxu1  ;;  %v482_v41 = vrot.slane %v4632_v5, %v5287_v30  ;;  %v999_v48 = vpop.f32.mrb[30].mxu0  ;;  %v1598_v30 = vpack.c.bf16 %v1580_v17, %v1578_v6  ;;  %v1728_v58 = vmul.f32 %v4453_v38, %v1450_v59  ;;  %v1726_v17 = vmul.f32 %v4449_v36, %v1442_v18 }
 0x185   : > { %v1109_v43 = vadd.f32 %v1108_v50, %v4491_v55  ;;  %v1110_v54 = vpop.f32.mrb[29].mxu1  ;;  %v1745_v51 = vpack.c.bf16 %v4712_v21, %v4706_v15  ;;  %v1000_v45 = vadd.f32 %v999_v48, %v4488_v9  ;;  %v4732_v56 = vrot.slane %v5288_v20, %v4473_v52  ;;  %v1001_v31 = vpop.f32.mrb[31].mxu0 }
 0x186   : > { %v1111_v2 = vadd.f32 %v1110_v54, %v4506_v49  ;;  %v1112_v26 = vpop.f32.mrb[30].mxu1  ;;  %v1455_v23 = vmax.f32 %v996_v7, 0.0  ;;  %v998_v15 = vadd.f32 %v997_v32, %v4494_v29  ;;  %v1002_v6 = vadd.f32 %v1001_v31, %v4494_v29  ;;  %2673 = vmatprep.mubr.bf16.mxu0 %v1598_v30  ;;  %v4755_v18 = vpop.permute.xlu1 %1966 }
 0x187   : > { %v1113_v21 = vadd.f32 %v1112_v26, %v4491_v55  ;;  %v1114_v50 = vpop.f32.mrb[31].mxu1  ;;  %v1457_v54 = vmax.f32 %v1109_v43, 0.0  ;;  %v1463_v9 = vmax.f32 %v1000_v45, 0.0  ;;  %v4741_v5 = vrot.slane %v4687_v63, %v4473_v52  ;;  %v4749_v26 = vpop.permute.xlu0 %1942  ;;  %5289 = vst [vmem:[#allocation39_spill] sm:$0xff] %v4755_v18 }
 0x188   : > { %v1458_v16 = vmax.f32 %v1111_v2, 0.0  ;;  %v4744_v59 = vrot.slane %v474_v4, %v4473_v52  ;;  %v4747_v7 = vrot.slane %v482_v41, %v4473_v52  ;;  %v1464_v29 = vmax.f32 %v1002_v6, 0.0 }
 0x189   : > { %v4752_v55 = vmul.f32 %v4457_v42, %v1463_v9  ;;  %v1465_v32 = vmax.f32 %v1113_v21, 0.0  ;;  %v1115_v43 = vadd.f32 %v1114_v50, %v4506_v49  ;;  %v1581_v63 = vmul.f32 %v4604_v60, %v1455_v23 }
 0x18a   : > { %v1456_v48 = vmax.f32 %v998_v15, 0.0  ;;  %v1746_v2 = vpack.c.bf16 %v1728_v58, %v1726_v17  ;;  %v1729_v45 = vmul.f32 %v4642_v12, %v1457_v54  ;;  %v1730_v41 = vmul.f32 %v4642_v12, %v1458_v16  ;;  %2674 = vmatmul.mubr.bf16.gmra.mrb[88].mxu0 %v1597_v28 }
 0x18b   : > { %v1151_v4 = vpop.f32.mrb[32].mxu0  ;;  %v1466_v30 = vmax.f32 %v1115_v43, 0.0  ;;  %v1599_v58 = vpack.c.bf16 %v4752_v55, %v1581_v63  ;;  %v1731_v15 = vmul.f32 %v4469_v47, %v1465_v32  ;;  %v1584_v54 = vmul.f32 %v4457_v42, %v1464_v29 }
 0x18c   : > { %v1152_v20 = vadd.f32 %v1151_v4, %v4732_v56  ;;  %v1264_v31 = vpop.f32.mrb[32].mxu1  ;;  %v1153_v9 = vpop.f32.mrb[33].mxu0  ;;  %2770 = vmatprep.mubr.bf16.mxu1 %v1746_v2  ;;  %v1582_v55 = vmul.f32 %v4604_v60, %v1456_v48 }
 0x18d   : > { %v1265_v49 = vadd.f32 %v1264_v31, %v4741_v5  ;;  %v1154_v21 = vadd.f32 %v1153_v9, %v4744_v59  ;;  %v1266_v50 = vpop.f32.mrb[33].mxu1  ;;  %v1155_v23 = vpop.f32.mrb[34].mxu0  ;;  %2771 = vmatmul.mubr.bf16.gmra.mrb[88].mxu1 %v1745_v51  ;;  %v1732_v28 = vmul.f32 %v4469_v47, %v1466_v30 }
 0x18e   : > { %v1347_v16 = vmax.f32 %v1152_v20, 0.0  ;;  %v1267_v6 = vadd.f32 %v1266_v50, %v4747_v7  ;;  %v1268_v17 = vpop.f32.mrb[34].mxu1  ;;  %v1157_v43 = vpop.f32.mrb[35].mxu0  ;;  %v1156_v4 = vadd.f32 %v1155_v23, %v4732_v56  ;;  %v1600_v47 = vpack.c.bf16 %v1584_v54, %v1582_v55 }
 0x18f   : > { %v1349_v2 = vmax.f32 %v1265_v49, 0.0  ;;  %v1269_v31 = vadd.f32 %v1268_v17, %v4741_v5  ;;  %v1270_v9 = vpop.f32.mrb[35].mxu1  ;;  %v1348_v63 = vmax.f32 %v1154_v21, 0.0  ;;  %v1158_v32 = vadd.f32 %v1157_v43, %v4744_v59  ;;  %v4776_v30 = vpop.permute.xlu0 %1958  ;;  %v5291_v43 = vld [vmem:[#allocation33_spill] sm:$0xff] }
 0x190   : > { %v1271_v51 = vadd.f32 %v1270_v9, %v4747_v7  ;;  %v4774_v29 = vmul.f32 %v4485_v19, %v1347_v16  ;;  %v1350_v20 = vmax.f32 %v1267_v6, 0.0  ;;  %v1355_v50 = vmax.f32 %v1156_v4, 0.0  ;;  %v4781_v48 = vpop.permute.xlu1 %1970  ;;  %2681 = vmatprep.mubr.bf16.mxu0 %v1600_v47 }
 0x191   : > { %v1357_v42 = vmax.f32 %v1269_v31, 0.0  ;;  %v4779_v49 = vmul.f32 %v4501_v62, %v1349_v2  ;;  %v1356_v23 = vmax.f32 %v1158_v32, 0.0  ;;  %5290 = vst [vmem:[#allocation40_spill] sm:$0xff] %v4781_v48  ;;  %v1748_v12 = vpack.c.bf16 %v1732_v28, %v1730_v41 }
 0x192   : > { %v1358_v17 = vmax.f32 %v1271_v51, 0.0  ;;  %v1851_v21 = vmul.f32 %v4673_v39, %v1355_v50  ;;  %v1747_v16 = vpack.c.bf16 %v1731_v15, %v1729_v45  ;;  %v1850_v6 = vmul.f32 %v4485_v19, %v1348_v63  ;;  %2682 = vmatmul.mubr.bf16.gmra.mrb[92].mxu0 %v1599_v58 }
 0x193   : > { %v1999_v9 = vmul.f32 %v5291_v43, %v1357_v42  ;;  %v1161_v60 = vpop.f32.mrb[36].mxu0  ;;  %v1852_v4 = vmul.f32 %v4673_v39, %v1356_v23  ;;  %2778 = vmatprep.mubr.bf16.mxu1 %v1748_v12 }
 0x194   : > { %v2000_v31 = vmul.f32 %v5291_v43, %v1358_v17  ;;  %v1162_v2 = vadd.f32 %v1161_v60, %v4732_v56  ;;  %v1163_v54 = vpop.f32.mrb[37].mxu0  ;;  %v1881_v55 = vpack.c.bf16 %v1851_v21, %v4774_v29  ;;  %v1998_v17 = vmul.f32 %v4501_v62, %v1350_v20 }
 0x195   : > { %v1274_v32 = vpop.f32.mrb[36].mxu1  ;;  %v2029_v51 = vpack.c.bf16 %v1999_v9, %v4779_v49  ;;  %v1165_v41 = vpop.f32.mrb[38].mxu0  ;;  %2779 = vmatmul.mubr.bf16.gmra.mrb[92].mxu1 %v1747_v16  ;;  %v1164_v28 = vadd.f32 %v1163_v54, %v4744_v59  ;;  %v1882_v49 = vpack.c.bf16 %v1852_v4, %v1850_v6 }
 0x196   : > { %v1275_v42 = vadd.f32 %v1274_v32, %v4741_v5  ;;  %v1276_v45 = vpop.f32.mrb[37].mxu1  ;;  %v1363_v15 = vmax.f32 %v1162_v2, 0.0  ;;  %v1166_v60 = vadd.f32 %v1165_v41, %v4732_v56  ;;  %v1167_v50 = vpop.f32.mrb[39].mxu0  ;;  %v2030_v6 = vpack.c.bf16 %v2000_v31, %v1998_v17 }
 0x197   : > { %v1277_v47 = vadd.f32 %v1276_v45, %v4747_v7  ;;  %v1278_v63 = vpop.f32.mrb[38].mxu1  ;;  %v1168_v12 = vadd.f32 %v1167_v50, %v4744_v59  ;;  %v1364_v21 = vmax.f32 %v1164_v28, 0.0  ;;  %2819 = vmatprep.mubr.bf16.mxu0 %v1882_v49  ;;  %v4799_v45 = vpop.permute.xlu0 %1810 }
 0x198   : > { %v1365_v23 = vmax.f32 %v1275_v42, 0.0  ;;  %v1279_v29 = vadd.f32 %v1278_v63, %v4741_v5  ;;  %v1280_v58 = vpop.f32.mrb[39].mxu1  ;;  %v1371_v16 = vmax.f32 %v1166_v60, 0.0  ;;  %v1853_v42 = vmul.f32 %v4695_v11, %v1363_v15  ;;  %v5292_v63 = vld [vmem:[#allocation34_spill] sm:$0xff]  ;;  %v4806_v4 = vpop.permute.xlu1 %1830  ;;  %2916 = vmatprep.mubr.bf16.mxu1 %v2030_v6 }
 0x199   : > { %v1366_v9 = vmax.f32 %v1277_v47, 0.0  ;;  %v1372_v32 = vmax.f32 %v1168_v12, 0.0  ;;  %v1281_v54 = vadd.f32 %v1280_v58, %v4747_v7  ;;  %v1854_v20 = vmul.f32 %v4695_v11, %v1364_v21 }
 0x19a   : > { %v1373_v2 = vmax.f32 %v1279_v29, 0.0  ;;  %v4803_v41 = vmul.f32 %v4749_v26, %v1365_v23  ;;  %v1855_v50 = vmul.f32 %v5292_v63, %v1371_v16  ;;  %2820 = vmatmul.mubr.bf16.vlgmr.msra.gmra.mrb[96].mxu0 %v1881_v55 }
 0x19b   : > { %v1856_v47 = vmul.f32 %v5292_v63, %v1372_v32  ;;  %v1374_v60 = vmax.f32 %v1281_v54, 0.0  ;;  %v1171_v29 = vpop.f32.mrb[40].mxu0  ;;  %v2002_v12 = vmul.f32 %v4749_v26, %v1366_v9 }
 0x19c   : > { %v2003_v28 = vmul.f32 %v4564_v35, %v1373_v2  ;;  %v1172_v15 = vadd.f32 %v1171_v29, %v4732_v56  ;;  %v1173_v58 = vpop.f32.mrb[41].mxu0  ;;  %v1883_v49 = vpack.c.bf16 %v1855_v50, %v1853_v42 }
 0x19d   : > { %v1284_v23 = vpop.f32.mrb[40].mxu1  ;;  %v2004_v31 = vmul.f32 %v4564_v35, %v1374_v60  ;;  %v1174_v21 = vadd.f32 %v1173_v58, %v4744_v59  ;;  %v1175_v2 = vpop.f32.mrb[42].mxu0  ;;  %v1884_v32 = vpack.c.bf16 %v1856_v47, %v1854_v20  ;;  %2917 = vmatmul.mubr.bf16.vlgmr.msra.gmra.mrb[96].mxu1 %v2029_v51 }
 0x19e   : > { %v1285_v17 = vadd.f32 %v1284_v23, %v4741_v5  ;;  %v1286_v16 = vpop.f32.mrb[41].mxu1  ;;  %v1379_v54 = vmax.f32 %v1172_v15, 0.0  ;;  %v1176_v6 = vadd.f32 %v1175_v2, %v4732_v56  ;;  %v1177_v38 = vpop.f32.mrb[43].mxu0  ;;  %v2031_v42 = vpack.c.bf16 %v2003_v28, %v4803_v41 }
 0x19f   : > { %v1287_v9 = vadd.f32 %v1286_v16, %v4747_v7  ;;  %v1288_v29 = vpop.f32.mrb[42].mxu1  ;;  %v1380_v60 = vmax.f32 %v1174_v21, 0.0  ;;  %v1178_v23 = vadd.f32 %v1177_v38, %v4744_v59  ;;  %2827 = vmatprep.mubr.bf16.mxu0 %v1884_v32  ;;  %v4822_v16 = vpop.permute.xlu0 %1822 }
 0x1a0   : > { %v1381_v50 = vmax.f32 %v1285_v17, 0.0  ;;  %v1289_v55 = vadd.f32 %v1288_v29, %v4741_v5  ;;  %v1290_v58 = vpop.f32.mrb[43].mxu1  ;;  %v1387_v20 = vmax.f32 %v1176_v6, 0.0  ;;  %v1857_v2 = vmul.f32 %v4586_v10, %v1379_v54  ;;  %v4826_v21 = vpop.permute.xlu1 %1978 }
 0x1a1   : > { %v1382_v36 = vmax.f32 %v1287_v9, 0.0  ;;  %v1291_v51 = vadd.f32 %v1290_v58, %v4747_v7  ;;  %v1388_v15 = vmax.f32 %v1178_v23, 0.0  ;;  %v2032_v17 = vpack.c.bf16 %v2004_v31, %v2002_v12  ;;  %5293 = vst [vmem:[#allocation33_spill] sm:$0xff] %v4826_v21 }
 0x1a2   : > { %v1389_v47 = vmax.f32 %v1289_v55, 0.0  ;;  %v1859_v41 = vmul.f32 %v4724_v34, %v1387_v20  ;;  %v2005_v38 = vmul.f32 %v4610_v8, %v1381_v50  ;;  %v1858_v32 = vmul.f32 %v4586_v10, %v1380_v60  ;;  %2828 = vmatmul.mubr.bf16.gmra.mrb[100].mxu0 %v1883_v49 }
 0x1a3   : > { %v1390_v28 = vmax.f32 %v1291_v51, 0.0  ;;  %v1860_v6 = vmul.f32 %v4724_v34, %v1388_v15  ;;  %v1181_v29 = vpop.f32.mrb[44].mxu0  ;;  %v2006_v55 = vmul.f32 %v4610_v8, %v1382_v36  ;;  %2924 = vmatprep.mubr.bf16.mxu1 %v2032_v17 }
 0x1a4   : > { %v2007_v9 = vmul.f32 %v4634_v46, %v1389_v47  ;;  %v1182_v54 = vadd.f32 %v1181_v29, %v4732_v56  ;;  %v1183_v12 = vpop.f32.mrb[45].mxu0  ;;  %v1885_v31 = vpack.c.bf16 %v1859_v41, %v1857_v2 }
 0x1a5   : > { %v2008_v23 = vmul.f32 %v4634_v46, %v1390_v28  ;;  %v1294_v58 = vpop.f32.mrb[44].mxu1  ;;  %v1184_v60 = vadd.f32 %v1183_v12, %v4744_v59  ;;  %v1185_v51 = vpop.f32.mrb[46].mxu0  ;;  %v1886_v47 = vpack.c.bf16 %v1860_v6, %v1858_v32  ;;  %2925 = vmatmul.mubr.bf16.gmra.mrb[100].mxu1 %v2031_v42 }
 0x1a6   : > { %v1295_v50 = vadd.f32 %v1294_v58, %v4741_v5  ;;  %v1296_v20 = vpop.f32.mrb[45].mxu1  ;;  %v2033_v15 = vpack.c.bf16 %v2007_v9, %v2005_v38  ;;  %v1395_v25 = vmax.f32 %v1182_v54, 0.0  ;;  %v1186_v28 = vadd.f32 %v1185_v51, %v4732_v56  ;;  %v1187_v29 = vpop.f32.mrb[47].mxu0 }
 0x1a7   : > { %v1297_v36 = vadd.f32 %v1296_v20, %v4747_v7  ;;  %v1298_v17 = vpop.f32.mrb[46].mxu1  ;;  %v2034_v14 = vpack.c.bf16 %v2008_v23, %v2006_v55  ;;  %v1396_v2 = vmax.f32 %v1184_v60, 0.0  ;;  %v1188_v41 = vadd.f32 %v1187_v29, %v4744_v59  ;;  %2835 = vmatprep.mubr.bf16.mxu0 %v1886_v47  ;;  %v4842_v6 = vpop.permute.xlu0 %1826 }
 0x1a8   : > { %v1397_v57 = vmax.f32 %v1295_v50, 0.0  ;;  %v1299_v49 = vadd.f32 %v1298_v17, %v4741_v5  ;;  %v1300_v58 = vpop.f32.mrb[47].mxu1  ;;  %v1403_v32 = vmax.f32 %v1186_v28, 0.0  ;;  %v1861_v54 = vmul.f32 %v4799_v45, %v1395_v25  ;;  %v4846_v50 = vpop.permute.xlu1 %1834 }
 0x1a9   : > { %v1398_v12 = vmax.f32 %v1297_v36, 0.0  ;;  %v1301_v42 = vadd.f32 %v1300_v58, %v4747_v7  ;;  %2932 = vmatprep.mubr.bf16.mxu1 %v2034_v14  ;;  %v1404_v9 = vmax.f32 %v1188_v41, 0.0  ;;  %v1862_v20 = vmul.f32 %v4799_v45, %v1396_v2 }
 0x1aa   : > { %v1405_v38 = vmax.f32 %v1299_v49, 0.0  ;;  %v1863_v55 = vmul.f32 %v4656_v13, %v1403_v32  ;;  %v2009_v60 = vmul.f32 %v4776_v30, %v1397_v57  ;;  %2836 = vmatmul.mubr.bf16.gmra.mrb[104].mxu0 %v1885_v31 }
 0x1ab   : > { %v1406_v23 = vmax.f32 %v1301_v42, 0.0  ;;  %v1864_v47 = vmul.f32 %v4656_v13, %v1404_v9  ;;  %v1191_v14 = vpop.f32.mrb[48].mxu0  ;;  %v2010_v36 = vmul.f32 %v4776_v30, %v1398_v12 }
 0x1ac   : > { %v2011_v51 = vmul.f32 %v4680_v1, %v1405_v38  ;;  %v1192_v25 = vadd.f32 %v1191_v14, %v4732_v56  ;;  %v1193_v29 = vpop.f32.mrb[49].mxu0  ;;  %v1887_v49 = vpack.c.bf16 %v1863_v55, %v1861_v54 }
 0x1ad   : > { %v2012_v28 = vmul.f32 %v4680_v1, %v1406_v23  ;;  %v1304_v17 = vpop.f32.mrb[48].mxu1  ;;  %v1194_v57 = vadd.f32 %v1193_v29, %v4744_v59  ;;  %v1195_v58 = vpop.f32.mrb[50].mxu0  ;;  %v1888_v32 = vpack.c.bf16 %v1864_v47, %v1862_v20  ;;  %2933 = vmatmul.mubr.bf16.gmra.mrb[104].mxu1 %v2033_v15 }
 0x1ae   : > { %v1305_v41 = vadd.f32 %v1304_v17, %v4741_v5  ;;  %v1306_v2 = vpop.f32.mrb[49].mxu1  ;;  %v2035_v42 = vpack.c.bf16 %v2011_v51, %v2009_v60  ;;  %v1411_v38 = vmax.f32 %v1192_v25, 0.0  ;;  %v1196_v9 = vadd.f32 %v1195_v58, %v4732_v56  ;;  %v1197_v14 = vpop.f32.mrb[51].mxu0 }
 0x1af   : > { %v1307_v12 = vadd.f32 %v1306_v2, %v4747_v7  ;;  %v1308_v23 = vpop.f32.mrb[50].mxu1  ;;  %v2036_v24 = vpack.c.bf16 %v2012_v28, %v2010_v36  ;;  %v1412_v54 = vmax.f32 %v1194_v57, 0.0  ;;  %v1198_v55 = vadd.f32 %v1197_v14, %v4744_v59  ;;  %2843 = vmatprep.mubr.bf16.mxu0 %v1888_v32  ;;  %v4862_v47 = vpop.permute.xlu0 %1974 }
 0x1b0   : > { %v1413_v3 = vmax.f32 %v1305_v41, 0.0  ;;  %v1309_v31 = vadd.f32 %v1308_v23, %v4741_v5  ;;  %v1310_v17 = vpop.f32.mrb[51].mxu1  ;;  %v1419_v20 = vmax.f32 %v1196_v9, 0.0  ;;  %v1865_v25 = vmul.f32 %v4708_v61, %v1411_v38  ;;  %v4866_v41 = vpop.permute.xlu1 %1982 }
 0x1b1   : > { %v1414_v29 = vmax.f32 %v1307_v12, 0.0  ;;  %v1311_v15 = vadd.f32 %v1310_v17, %v4747_v7  ;;  %2940 = vmatprep.mubr.bf16.mxu1 %v2036_v24  ;;  %v1420_v51 = vmax.f32 %v1198_v55, 0.0  ;;  %5294 = vst [vmem:[#allocation34_spill] sm:$0xff] %v4866_v41  ;;  %v1866_v2 = vmul.f32 %v4708_v61, %v1412_v54 }
 0x1b2   : > { %v1421_v60 = vmax.f32 %v1309_v31, 0.0  ;;  %v1867_v36 = vmul.f32 %v4822_v16, %v1419_v20  ;;  %v2013_v57 = vmul.f32 %v4755_v18, %v1413_v3  ;;  %2844 = vmatmul.mubr.bf16.gmra.mrb[108].mxu0 %v1887_v49 }
 0x1b3   : > { %v1422_v28 = vmax.f32 %v1311_v15, 0.0  ;;  %v1868_v32 = vmul.f32 %v4822_v16, %v1420_v51  ;;  %v1201_v24 = vpop.f32.mrb[52].mxu0  ;;  %v2014_v12 = vmul.f32 %v4755_v18, %v1414_v29 }
 0x1b4   : > { %v2015_v58 = vmul.f32 %v4781_v48, %v1421_v60  ;;  %v1202_v38 = vadd.f32 %v1201_v24, %v4732_v56  ;;  %v1203_v14 = vpop.f32.mrb[53].mxu0  ;;  %v1889_v31 = vpack.c.bf16 %v1867_v36, %v1865_v25 }
 0x1b5   : > { %v2016_v9 = vmul.f32 %v4781_v48, %v1422_v28  ;;  %v1314_v23 = vpop.f32.mrb[52].mxu1  ;;  %v1204_v3 = vadd.f32 %v1203_v14, %v4744_v59  ;;  %v1205_v17 = vpop.f32.mrb[54].mxu0  ;;  %v1890_v20 = vpack.c.bf16 %v1868_v32, %v1866_v2  ;;  %2941 = vmatmul.mubr.bf16.gmra.mrb[108].mxu1 %v2035_v42 }
 0x1b6   : > { %v1315_v55 = vadd.f32 %v1314_v23, %v4741_v5  ;;  %v1316_v54 = vpop.f32.mrb[53].mxu1  ;;  %v2037_v15 = vpack.c.bf16 %v2015_v58, %v2013_v57  ;;  %v1427_v60 = vmax.f32 %v1202_v38, 0.0  ;;  %v1206_v51 = vadd.f32 %v1205_v17, %v4732_v56  ;;  %v1207_v24 = vpop.f32.mrb[55].mxu0 }
 0x1b7   : > { %v1317_v29 = vadd.f32 %v1316_v54, %v4747_v7  ;;  %v1318_v28 = vpop.f32.mrb[54].mxu1  ;;  %v2038_v48 = vpack.c.bf16 %v2016_v9, %v2014_v12  ;;  %v1428_v25 = vmax.f32 %v1204_v3, 0.0  ;;  %v1208_v36 = vadd.f32 %v1207_v24, %v4744_v59  ;;  %2851 = vmatprep.mubr.bf16.mxu0 %v1890_v20  ;;  %v4885_v38 = vpop.permute.xlu0 %1838 }
 0x1b8   : > { %v1429_v18 = vmax.f32 %v1315_v55, 0.0  ;;  %v1319_v49 = vadd.f32 %v1318_v28, %v4741_v5  ;;  %v1320_v23 = vpop.f32.mrb[55].mxu1  ;;  %v1435_v2 = vmax.f32 %v1206_v51, 0.0  ;;  %5295 = vst [vmem:[#allocation41_spill] sm:$0xff] %v4885_v38  ;;  %v1869_v12 = vmul.f32 %v4842_v6, %v1427_v60  ;;  %v4890_v54 = vpop.permute.xlu1 %1986 }
 0x1b9   : > { %v1430_v14 = vmax.f32 %v1317_v29, 0.0  ;;  %v1321_v42 = vadd.f32 %v1320_v23, %v4747_v7  ;;  %2948 = vmatprep.mubr.bf16.mxu1 %v2038_v48  ;;  %v1436_v32 = vmax.f32 %v1208_v36, 0.0  ;;  %5296 = vst [vmem:[#allocation42_spill] sm:$0xff] %v4890_v54  ;;  %v1870_v17 = vmul.f32 %v4842_v6, %v1428_v25 }
 0x1ba   : > { %v4883_v57 = vmul.f32 %v4862_v47, %v1429_v18  ;;  %v1437_v58 = vmax.f32 %v1319_v49, 0.0  ;;  %v1871_v55 = vmul.f32 %v4806_v4, %v1435_v2  ;;  %2852 = vmatmul.mubr.bf16.gmra.mrb[112].mxu0 %v1889_v31 }
 0x1bb   : > { %v2018_v9 = vmul.f32 %v4862_v47, %v1430_v14  ;;  %v1438_v3 = vmax.f32 %v1321_v42, 0.0  ;;  %v1872_v18 = vmul.f32 %v4806_v4, %v1436_v32  ;;  %v1211_v20 = vpop.f32.mrb[56].mxu0 }
 0x1bc   : > { %v2019_v48 = vmul.f32 %v4826_v21, %v1437_v58  ;;  %v1212_v51 = vadd.f32 %v1211_v20, %v4732_v56  ;;  %v1213_v60 = vpop.f32.mrb[57].mxu0  ;;  %v1891_v24 = vpack.c.bf16 %v1871_v55, %v1869_v12 }
 0x1bd   : > { %v2020_v29 = vmul.f32 %v4826_v21, %v1438_v3  ;;  %v1324_v28 = vpop.f32.mrb[56].mxu1  ;;  %v1214_v36 = vadd.f32 %v1213_v60, %v4744_v59  ;;  %v1215_v14 = vpop.f32.mrb[58].mxu0  ;;  %v1892_v25 = vpack.c.bf16 %v1872_v18, %v1870_v17  ;;  %2949 = vmatmul.mubr.bf16.gmra.mrb[112].mxu1 %v2037_v15 }
 0x1be   : > { %v1325_v49 = vadd.f32 %v1324_v28, %v4741_v5  ;;  %v1326_v23 = vpop.f32.mrb[57].mxu1  ;;  %v2039_v2 = vpack.c.bf16 %v2019_v48, %v4883_v57  ;;  %v1443_v42 = vmax.f32 %v1212_v51, 0.0  ;;  %v1216_v32 = vadd.f32 %v1215_v14, %v4732_v56  ;;  %v1217_v20 = vpop.f32.mrb[59].mxu0 }
 0x1bf   : > { %v1327_v58 = vadd.f32 %v1326_v23, %v4747_v7  ;;  %v1328_v3 = vpop.f32.mrb[58].mxu1  ;;  %v2040_v21 = vpack.c.bf16 %v2020_v29, %v2018_v9  ;;  %v1444_v31 = vmax.f32 %v1214_v36, 0.0  ;;  %v1218_v28 = vadd.f32 %v1217_v20, %v4744_v59  ;;  %2859 = vmatprep.mubr.bf16.mxu0 %v1892_v25  ;;  %v4905_v51 = vpop.permute.xlu0 %1842 }
 0x1c0   : > { %v1445_v12 = vmax.f32 %v1325_v49, 0.0  ;;  %v1329_v55 = vadd.f32 %v1328_v3, %v4741_v5  ;;  %v1330_v60 = vpop.f32.mrb[59].mxu1  ;;  %v1451_v18 = vmax.f32 %v1216_v32, 0.0  ;;  %v1873_v23 = vmul.f32 %v4846_v50, %v1443_v42  ;;  %v4909_v49 = vpop.permute.xlu1 %1846 }
 0x1c1   : > { %v1446_v17 = vmax.f32 %v1327_v58, 0.0  ;;  %v1331_v15 = vadd.f32 %v1330_v60, %v4747_v7  ;;  %2956 = vmatprep.mubr.bf16.mxu1 %v2040_v21  ;;  %v1452_v48 = vmax.f32 %v1218_v28, 0.0  ;;  %v1874_v14 = vmul.f32 %v4846_v50, %v1444_v31 }
 0x1c2   : > { %v1453_v57 = vmax.f32 %v1329_v55, 0.0  ;;  %v1875_v9 = vmul.f32 %v4885_v38, %v1451_v18  ;;  %v2021_v36 = vmul.f32 %v4866_v41, %v1445_v12  ;;  %2860 = vmatmul.mubr.bf16.gmra.mrb[116].mxu0 %v1891_v24 }
 0x1c3   : > { %v1454_v29 = vmax.f32 %v1331_v15, 0.0  ;;  %v1876_v58 = vmul.f32 %v4885_v38, %v1452_v48  ;;  %v1221_v21 = vpop.f32.mrb[60].mxu0  ;;  %v2022_v32 = vmul.f32 %v4866_v41, %v1446_v17 }
 0x1c4   : > { %v2023_v25 = vmul.f32 %v4890_v54, %v1453_v57  ;;  %v1222_v42 = vadd.f32 %v1221_v21, %v4732_v56  ;;  %v1223_v55 = vpop.f32.mrb[61].mxu0  ;;  %v1893_v28 = vpack.c.bf16 %v1875_v9, %v1873_v23 }
 0x1c5   : > { %v2024_v3 = vmul.f32 %v4890_v54, %v1454_v29  ;;  %v1334_v20 = vpop.f32.mrb[60].mxu1  ;;  %v1224_v12 = vadd.f32 %v1223_v55, %v4744_v59  ;;  %v1225_v18 = vpop.f32.mrb[62].mxu0  ;;  %v1894_v15 = vpack.c.bf16 %v1876_v58, %v1874_v14  ;;  %2957 = vmatmul.mubr.bf16.gmra.mrb[116].mxu1 %v2039_v2 }
 0x1c6   : > { %v1335_v60 = vadd.f32 %v1334_v20, %v4741_v5  ;;  %v1336_v31 = vpop.f32.mrb[61].mxu1  ;;  %v2041_v57 = vpack.c.bf16 %v2023_v25, %v2021_v36  ;;  %v1459_v48 = vmax.f32 %v1222_v42, 0.0  ;;  %v1226_v29 = vadd.f32 %v1225_v18, %v4732_v56  ;;  %v1227_v21 = vpop.f32.mrb[63].mxu0 }
 0x1c7   : > { %v1337_v17 = vadd.f32 %v1336_v31, %v4747_v7  ;;  %v1338_v54 = vpop.f32.mrb[62].mxu1  ;;  %v2042_v41 = vpack.c.bf16 %v2024_v3, %v2022_v32  ;;  %v1460_v23 = vmax.f32 %v1224_v12, 0.0  ;;  %v1228_v9 = vadd.f32 %v1227_v21, %v4744_v59  ;;  %2867 = vmatprep.mubr.bf16.mxu0 %v1894_v15  ;;  %v4924_v55 = vpop.permute.xlu0 %1990  ;;  %v1471_v15 = vld [vmem:[%s5209_s5] sm:$0x3] }
 0x1c8   : > { %v1461_v38 = vmax.f32 %v1335_v60, 0.0  ;;  %v1339_v24 = vadd.f32 %v1338_v54, %v4741_v5  ;;  %v1340_v20 = vpop.f32.mrb[63].mxu1  ;;  %v1467_v2 = vmax.f32 %v1226_v29, 0.0  ;;  %v4928_v32 = vpop.permute.xlu1 %1994  ;;  %v1877_v3 = vmul.f32 %v4905_v51, %v1459_v48 }
 0x1c9   : > { %v1462_v36 = vmax.f32 %v1337_v17, 0.0  ;;  %v1341_v14 = vadd.f32 %v1340_v20, %v4747_v7  ;;  %2964 = vmatprep.mubr.bf16.mxu1 %v2042_v41  ;;  %v1468_v58 = vmax.f32 %v1228_v9, 0.0  ;;  %v1878_v42 = vmul.f32 %v4905_v51, %v1460_v23  ;;  %v5298_v20 = vld [vmem:[#allocation22_spill] sm:$0xff] }
 0x1ca   : > { %v2025_v56 = vmul.f32 %v4924_v55, %v1461_v38  ;;  %v1469_v25 = vmax.f32 %v1339_v24, 0.0  ;;  %v1879_v59 = vmul.f32 %v4909_v49, %v1467_v2  ;;  %2868 = vmatmul.mubr.bf16.gmra.mrb[120].mxu0 %v1893_v28  ;;  %v1472_v48 = vunpack.c.l.bf16 %v1471_v15  ;;  %v5297_v24 = vld [vmem:[#allocation11_spill] sm:$0xff]  ;;  %v5299_v2 = vld [vmem:[#allocation12_spill] sm:$0xff] }
 0x1cb   : > { %v2026_v5 = vmul.f32 %v4924_v55, %v1462_v36  ;;  %v1470_v54 = vmax.f32 %v1341_v14, 0.0  ;;  %v1880_v7 = vmul.f32 %v4909_v49, %v1468_v58  ;;  %v1751_v17 = vsub.s32 1, %v4464_v44 }
 0x1cc   : > { %v2027_v60 = vmul.f32 %v4928_v32, %v1469_v25  ;;  %v1895_v38 = vpack.c.bf16 %v1879_v59, %v1877_v3  ;;  %v2047_v29 = vsub.s32 3, %v4464_v44  ;;  %v4946_v28 = vrot.slane %v1472_v48, %v4473_v52  ;;  %v5300_v44 = vld [vmem:[#allocation25_spill] sm:$0xff] }
 0x1cd   : > { %v2028_v41 = vmul.f32 %v4928_v32, %v1470_v54  ;;  %v1896_v12 = vpack.c.bf16 %v1880_v7, %v1878_v42  ;;  %2965 = vmatmul.mubr.bf16.gmra.mrb[120].mxu1 %v2041_v57  ;;  %v4943_v21 = vrot.slane %v1472_v48, %v1751_v17  ;;  %v4949_v57 = vrot.slane %v1472_v48, %v4476_v53 }
 0x1ce   : > { %v2043_v31 = vpack.c.bf16 %v2027_v60, %v2025_v56  ;;  %v4951_v23 = vrot.slane %v1472_v48, %v2047_v29  ;;  %v1605_v36 = vmul.f32 %v4946_v28, %v5298_v20  ;;  %v1606_v56 = vmul.f32 %v4946_v28, %v5300_v44  ;;  %v5302_v20 = vld [vmem:[#allocation14_spill] sm:$0xff] }
 0x1cf   : > { %v2044_v18 = vpack.c.bf16 %v2028_v41, %v2026_v5  ;;  %2875 = vmatprep.mubr.bf16.mxu0 %v1896_v12  ;;  %v1753_v9 = vmul.f32 %v4943_v21, %v5297_v24  ;;  %v1754_v14 = vmul.f32 %v4943_v21, %v5299_v2  ;;  %v1901_v52 = vmul.f32 %v4949_v57, %v4485_v19 }
 0x1d0   : > { %v1902_v58 = vmul.f32 %v4949_v57, %v4673_v39  ;;  %v2049_v3 = vmul.f32 %v4951_v23, %v4501_v62  ;;  %v2050_v54 = vmul.f32 %v4951_v23, %v5291_v43  ;;  %v1755_v60 = vmul.f32 %v4943_v21, %v4443_v33 }
 0x1d1   : > { %2972 = vmatprep.mubr.bf16.mxu1 %v2044_v18  ;;  %v1769_v25 = vadd.f32 %v1753_v9, %v1605_v36  ;;  %v1770_v53 = vadd.f32 %v1754_v14, %v1606_v56  ;;  %v1607_v19 = vmul.f32 %v4946_v28, %v4451_v37  ;;  %v1903_v43 = vmul.f32 %v4949_v57, %v4695_v11  ;;  %v5301_v9 = vld [vmem:[#allocation13_spill] sm:$0xff] }
 0x1d2   : > { %2876 = vmatmul.mubr.bf16.gmra.mrb[124].mxu0 %v1895_v38  ;;  %v1608_v37 = vmul.f32 %v4946_v28, %v5301_v9  ;;  %v1756_v36 = vmul.f32 %v4943_v21, %v5302_v20  ;;  %v1904_v11 = vmul.f32 %v4949_v57, %v5292_v63  ;;  %v2053_v20 = vmul.f32 %v4951_v23, %v4610_v8 }
 0x1d3   : > { %v1917_v59 = vadd.f32 %v1901_v52, %v1769_v25  ;;  %v1918_v38 = vadd.f32 %v1902_v58, %v1770_v53  ;;  %v1771_v48 = vadd.f32 %v1755_v60, %v1607_v19  ;;  %v2051_v52 = vmul.f32 %v4951_v23, %v4749_v26  ;;  %v5304_v26 = vld [vmem:[#allocation15_spill] sm:$0xff] }
 0x1d4   : > { %v1609_v25 = vmul.f32 %v4946_v28, %v4406_v22  ;;  %v1757_v53 = vmul.f32 %v4943_v21, %v4413_v40  ;;  %v1758_v60 = vmul.f32 %v4943_v21, %v5304_v26 }
 0x1d5   : > { %2973 = vmatmul.mubr.bf16.gmra.mrb[124].mxu1 %v2043_v31  ;;  %v2065_v12 = vadd.f32 %v2049_v3, %v1917_v59  ;;  %v2066_v15 = vadd.f32 %v2050_v54, %v1918_v38  ;;  %v1919_v56 = vadd.f32 %v1903_v43, %v1771_v48  ;;  %v1772_v3 = vadd.f32 %v1756_v36, %v1608_v37  ;;  %v5303_v54 = vld [vmem:[#allocation28_spill] sm:$0xff] }
 0x1d6   : > { %v1906_v37 = vmul.f32 %v4949_v57, %v4724_v34  ;;  %v1907_v34 = vmul.f32 %v4949_v57, %v4799_v45  ;;  %v2055_v45 = vmul.f32 %v4951_v23, %v4776_v30 }
 0x1d7   : > { %v2067_v22 = vadd.f32 %v2051_v52, %v1919_v56 }
 0x229   : > { %v3431_v5 = vpop.f32.mrb[64].mxu0 }
 0x22a   : > { %v3432_v42 = vpop.f32.mrb[65].mxu0 }
 0x22b   : > { %v3433_v7 = vadd.f32 %v3432_v42, %v3431_v5  ;;  %v3434_v41 = vpop.f32.mrb[66].mxu0  ;;  %v2052_v5 = vmul.f32 %v4951_v23, %v4564_v35  ;;  %v1610_v42 = vmul.f32 %v4946_v28, %v5303_v54  ;;  %v1905_v35 = vmul.f32 %v4949_v57, %v4586_v10  ;;  %v5306_v54 = vld [vmem:[#allocation16_spill] sm:$0xff] }
 0x22c   : > { %v3435_v39 = vpop.f32.mrb[67].mxu0  ;;  %v3495_v18 = vpop.f32.mrb[64].mxu1 }
 0x22d   : > { %v3436_v31 = vadd.f32 %v3435_v39, %v3434_v41  ;;  %v2628_v62 = vadd.f32 %v3433_v7, %v2065_v12  ;;  %v3496_v17 = vpop.f32.mrb[65].mxu1  ;;  %v1920_v7 = vadd.f32 %v1904_v11, %v1772_v3  ;;  %v1773_v12 = vadd.f32 %v1757_v53, %v1609_v25 }
 0x22e   : > { %v3497_v29 = vadd.f32 %v3496_v17, %v3495_v18  ;;  %v3498_v24 = vpop.f32.mrb[66].mxu1  ;;  %v5305_v17 = vld [vmem:[#allocation30_spill] sm:$0xff] }
 0x22f   : > { %v2631_v33 = vadd.f32 %v3436_v31, %v2066_v15  ;;  %v3499_v2 = vpop.f32.mrb[67].mxu1  ;;  %v2068_v15 = vadd.f32 %v2052_v5, %v1920_v7 }
 0x230   : > { %v4979_v14 = vadd.f32 %v3497_v29, %v2628_v62  ;;  %v3500_v44 = vadd.f32 %v3499_v2, %v3498_v24  ;;  %v1611_v29 = vmul.f32 %v4946_v28, %v5305_v17  ;;  %v1774_v24 = vadd.f32 %v1758_v60, %v1610_v42  ;;  %v5308_v17 = vld [vmem:[#allocation18_spill] sm:$0xff] }
 0x231   : > { %v1921_v2 = vadd.f32 %v1905_v35, %v1773_v12  ;;  %v1612_v42 = vmul.f32 %v4946_v28, %v5306_v54  ;;  %v1613_v30 = vmul.f32 %v4946_v28, %v5308_v17 }
 0x232   : > { %v4989_v58 = vadd.f32 %v3500_v44, %v2631_v33  ;;  %v1759_v33 = vmul.f32 %v4943_v21, %v4479_v27  ;;  %v2054_v44 = vmul.f32 %v4951_v23, %v4634_v46  ;;  %v1922_v53 = vadd.f32 %v1906_v37, %v1774_v24 }
 0x233   : > { %v2069_v3 = vadd.f32 %v2053_v20, %v1921_v2 }
 0x234   : > { %v3437_v59 = vpop.f32.mrb[68].mxu0  ;;  %v1775_v11 = vadd.f32 %v1759_v33, %v1611_v29  ;;  %v5309_v29 = vld [vmem:[#allocation19_spill] sm:$0xff] }
 0x235   : > { %v3501_v63 = vpop.f32.mrb[68].mxu1  ;;  %v3438_v19 = vpop.f32.mrb[69].mxu0  ;;  %v1761_v24 = vmul.f32 %v4943_v21, %v5309_v29 }
 0x236   : > { %v3439_v41 = vadd.f32 %v3438_v19, %v3437_v59  ;;  %v3502_v38 = vpop.f32.mrb[69].mxu1  ;;  %v3440_v40 = vpop.f32.mrb[70].mxu0  ;;  %v1923_v12 = vadd.f32 %v1907_v34, %v1775_v11 }
 0x237   : > { %v3503_v39 = vadd.f32 %v3502_v38, %v3501_v63  ;;  %v3504_v31 = vpop.f32.mrb[70].mxu1  ;;  %v3441_v18 = vpop.f32.mrb[71].mxu0  ;;  %v5307_v63 = vld [vmem:[#allocation17_spill] sm:$0xff] }
 0x238   : > { %v2636_v62 = vadd.f32 %v3439_v41, %v2067_v22  ;;  %v3442_v48 = vadd.f32 %v3441_v18, %v3440_v40  ;;  %v3505_v43 = vpop.f32.mrb[71].mxu1  ;;  %v1760_v19 = vmul.f32 %v4943_v21, %v5307_v63  ;;  %v2070_v22 = vadd.f32 %v2054_v44, %v1922_v53  ;;  %v5313_v63 = vld [vmem:[#allocation39_spill] sm:$0xff] }
 0x239   : > { %v3506_v9 = vadd.f32 %v3505_v43, %v3504_v31  ;;  %v1614_v43 = vmul.f32 %v4946_v28, %v4513_v0  ;;  %v1909_v53 = vmul.f32 %v4949_v57, %v4708_v61 }
 0x23a   : > { %v5007_v36 = vadd.f32 %v3503_v39, %v2636_v62  ;;  %v2639_v10 = vadd.f32 %v3442_v48, %v2068_v15  ;;  %v1908_v39 = vmul.f32 %v4949_v57, %v4656_v13  ;;  %v1776_v35 = vadd.f32 %v1760_v19, %v1612_v42  ;;  %v5310_v13 = vld [vmem:[#allocation20_spill] sm:$0xff] }
 0x23b   : > { %v2056_v62 = vmul.f32 %v4951_v23, %v4680_v1  ;;  %v1762_v33 = vmul.f32 %v4943_v21, %v5310_v13  ;;  %v1777_v42 = vadd.f32 %v1761_v24, %v1613_v30  ;;  %v2057_v19 = vmul.f32 %v4951_v23, %v5313_v63  ;;  %v5315_v30 = vld [vmem:[#allocation21_spill] sm:$0xff] }
 0x23c   : > { %v5011_v56 = vadd.f32 %v3506_v9, %v2639_v10  ;;  %v3443_v52 = vpop.f32.mrb[72].mxu0  ;;  %v1924_v20 = vadd.f32 %v1908_v39, %v1776_v35  ;;  %v2071_v10 = vadd.f32 %v2055_v45, %v1923_v12  ;;  %v1911_v39 = vmul.f32 %v4949_v57, %v4842_v6 }
 0x23d   : > { %v3444_v27 = vpop.f32.mrb[73].mxu0  ;;  %v1925_v61 = vadd.f32 %v1909_v53, %v1777_v42  ;;  %v1616_v29 = vmul.f32 %v4946_v28, %v5315_v30  ;;  %v5317_v53 = vld [vmem:[#allocation33_spill] sm:$0xff]  ;;  %v5323_v30 = vld [vmem:[#allocation38_spill] sm:$0xff] }
 0x23e   : > { %v3507_v25 = vpop.f32.mrb[72].mxu1  ;;  %v3445_v5 = vadd.f32 %v3444_v27, %v3443_v52  ;;  %v3446_v59 = vpop.f32.mrb[74].mxu0  ;;  %v5311_v52 = vld [vmem:[#allocation32_spill] sm:$0xff] }
 0x23f   : > { %v3508_v8 = vpop.f32.mrb[73].mxu1  ;;  %v3447_v46 = vpop.f32.mrb[75].mxu0  ;;  %v1763_v11 = vmul.f32 %v4943_v21, %v5311_v52  ;;  %v2059_v52 = vmul.f32 %v4951_v23, %v4862_v47  ;;  %v5320_v47 = vld [vmem:[#allocation26_spill] sm:$0xff] }
 0x240   : > { %v3509_v26 = vadd.f32 %v3508_v8, %v3507_v25  ;;  %v3510_v60 = vpop.f32.mrb[74].mxu1  ;;  %v2644_v7 = vadd.f32 %v3445_v5, %v2069_v3  ;;  %v3448_v41 = vadd.f32 %v3447_v46, %v3446_v59  ;;  %v2072_v3 = vadd.f32 %v2056_v62, %v1924_v20  ;;  %v5312_v59 = vld [vmem:[#allocation35_spill] sm:$0xff] }
 0x241   : > { %v3511_v38 = vpop.f32.mrb[75].mxu1  ;;  %v1615_v54 = vmul.f32 %v4946_v28, %v5312_v59  ;;  %v1910_v46 = vmul.f32 %v4949_v57, %v4822_v16  ;;  %v2073_v62 = vadd.f32 %v2057_v19, %v1925_v61 }
 0x242   : > { %v3512_v40 = vadd.f32 %v3511_v38, %v3510_v60  ;;  %v5023_v31 = vadd.f32 %v3509_v26, %v2644_v7  ;;  %v2647_v18 = vadd.f32 %v3448_v41, %v2070_v22  ;;  %v1778_v26 = vadd.f32 %v1762_v33, %v1614_v43  ;;  %v5314_v41 = vld [vmem:[#allocation40_spill] sm:$0xff] }
 0x243   : > { %v2058_v38 = vmul.f32 %v4951_v23, %v5314_v41  ;;  %v1779_v12 = vadd.f32 %v1763_v11, %v1615_v54  ;;  %v1912_v11 = vmul.f32 %v4949_v57, %v4806_v4  ;;  %v5319_v54 = vld [vmem:[#allocation24_spill] sm:$0xff]  ;;  %v5321_v4 = vld [vmem:[#allocation27_spill] sm:$0xff] }
 0x244   : > { %v5027_v15 = vadd.f32 %v3512_v40, %v2647_v18  ;;  %v1926_v16 = vadd.f32 %v1910_v46, %v1778_v26  ;;  %v1617_v42 = vmul.f32 %v4946_v28, %v5319_v54  ;;  %v1765_v26 = vmul.f32 %v4943_v21, %v5320_v47  ;;  %v5327_v47 = vld [vmem:[#allocation29_spill] sm:$0xff] }
 0x245   : > { %v3449_v48 = vpop.f32.mrb[76].mxu0 }
 0x246   : > { %v3513_v9 = vpop.f32.mrb[76].mxu1  ;;  %v3450_v37 = vpop.f32.mrb[77].mxu0 }
 0x247   : > { %v3451_v1 = vadd.f32 %v3450_v37, %v3449_v48  ;;  %v3514_v2 = vpop.f32.mrb[77].mxu1  ;;  %v3452_v44 = vpop.f32.mrb[78].mxu0 }
 0x248   : > { %v3515_v0 = vadd.f32 %v3514_v2, %v3513_v9  ;;  %v3516_v25 = vpop.f32.mrb[78].mxu1  ;;  %v3453_v27 = vpop.f32.mrb[79].mxu0  ;;  %v5316_v9 = vld [vmem:[#allocation23_spill] sm:$0xff]  ;;  %v1927_v2 = vadd.f32 %v1911_v39, %v1779_v12 }
 0x249   : > { %v2652_v34 = vadd.f32 %v3451_v1, %v2071_v10  ;;  %v3454_v5 = vadd.f32 %v3453_v27, %v3452_v44  ;;  %v3517_v8 = vpop.f32.mrb[79].mxu1  ;;  %v1764_v37 = vmul.f32 %v4943_v21, %v5316_v9  ;;  %v2074_v10 = vadd.f32 %v2058_v38, %v1926_v16  ;;  %v5324_v9 = vld [vmem:[#allocation41_spill] sm:$0xff] }
 0x24a   : > { %v3518_v60 = vadd.f32 %v3517_v8, %v3516_v25  ;;  %v5318_v8 = vld [vmem:[#allocation36_spill] sm:$0xff]  ;;  %v1913_v16 = vmul.f32 %v4949_v57, %v4846_v50 }
 0x24b   : > { %v5047_v7 = vadd.f32 %v3515_v0, %v2652_v34  ;;  %v2655_v22 = vadd.f32 %v3454_v5, %v2072_v3  ;;  %v1780_v27 = vadd.f32 %v1764_v37, %v1616_v29  ;;  %v2060_v34 = vmul.f32 %v4951_v23, %v5317_v53 }
 0x24c   : > { %v1618_v59 = vmul.f32 %v4946_v28, %v5318_v8  ;;  %v1767_v29 = vmul.f32 %v4943_v21, %v5323_v30  ;;  %v1914_v37 = vmul.f32 %v4949_v57, %v5324_v9 }
 0x24d   : > { %v5051_v45 = vadd.f32 %v3518_v60, %v2655_v22  ;;  %v3455_v40 = vpop.f32.mrb[80].mxu0  ;;  %v1766_v60 = vmul.f32 %v4943_v21, %v5321_v4  ;;  %v1928_v19 = vadd.f32 %v1912_v11, %v1780_v27  ;;  %v2075_v22 = vadd.f32 %v2059_v52, %v1927_v2  ;;  %v5326_v2 = vld [vmem:[#allocation42_spill] sm:$0xff] }
 0x24e   : > { %v3519_v18 = vpop.f32.mrb[80].mxu1  ;;  %v3456_v35 = vpop.f32.mrb[81].mxu0  ;;  %v1915_v27 = vmul.f32 %v4949_v57, %v4905_v51 }
 0x24f   : > { %v3457_v48 = vadd.f32 %v3456_v35, %v3455_v40  ;;  %v3520_v43 = vpop.f32.mrb[81].mxu1  ;;  %v3458_v17 = vpop.f32.mrb[82].mxu0  ;;  %v5322_v40 = vld [vmem:[#allocation37_spill] sm:$0xff] }
 0x250   : > { %v3521_v24 = vadd.f32 %v3520_v43, %v3519_v18  ;;  %v3522_v13 = vpop.f32.mrb[82].mxu1  ;;  %v3459_v33 = vpop.f32.mrb[83].mxu0  ;;  %v1619_v12 = vmul.f32 %v4946_v28, %v5322_v40 }
 0x251   : > { %v2660_v20 = vadd.f32 %v3457_v48, %v2073_v62  ;;  %v3460_v1 = vadd.f32 %v3459_v33, %v3458_v17  ;;  %v3523_v6 = vpop.f32.mrb[83].mxu1  ;;  %v2076_v48 = vadd.f32 %v2060_v34, %v1928_v19 }
 0x252   : > { %v3524_v44 = vadd.f32 %v3523_v6, %v3522_v13  ;;  %v1782_v13 = vadd.f32 %v1766_v60, %v1618_v59 }
 0x253   : > { %v5063_v0 = vadd.f32 %v3521_v24, %v2660_v20  ;;  %v2663_v25 = vadd.f32 %v3460_v1, %v2074_v10  ;;  %v1781_v24 = vadd.f32 %v1765_v26, %v1617_v42  ;;  %v5325_v20 = vld [vmem:[#allocation34_spill] sm:$0xff]  ;;  %v1620_v26 = vmul.f32 %v4946_v28, %v5327_v47 }
 0x254   : > { %v2061_v10 = vmul.f32 %v4951_v23, %v5325_v20 }
 0x255   : > { %v5067_v3 = vadd.f32 %v3524_v44, %v2663_v25  ;;  %v3461_v5 = vpop.f32.mrb[84].mxu0  ;;  %v1929_v50 = vadd.f32 %v1913_v16, %v1781_v24  ;;  %v2062_v44 = vmul.f32 %v4951_v23, %v5326_v2  ;;  %v1783_v25 = vadd.f32 %v1767_v29, %v1619_v12 }
 0x256   : > { %v3525_v46 = vpop.f32.mrb[84].mxu1  ;;  %v3462_v63 = vpop.f32.mrb[85].mxu0  ;;  %v2063_v12 = vmul.f32 %v4951_v23, %v4924_v55  ;;  %v2064_v16 = vmul.f32 %v4951_v23, %v4928_v32 }
 0x257   : > { %v3463_v61 = vadd.f32 %v3462_v63, %v3461_v5  ;;  %v3526_v41 = vpop.f32.mrb[85].mxu1  ;;  %v3464_v38 = vpop.f32.mrb[86].mxu0  ;;  %v1930_v5 = vadd.f32 %v1914_v37, %v1782_v13  ;;  %v2077_v8 = vadd.f32 %v2061_v10, %v1929_v50  ;;  %v5328_v63 = vld [vmem:[#allocation31_spill] sm:$0xff] }
 0x258   : > { %v3527_v39 = vadd.f32 %v3526_v41, %v3525_v46  ;;  %v3528_v18 = vpop.f32.mrb[86].mxu1  ;;  %v3465_v35 = vpop.f32.mrb[87].mxu0  ;;  %v1768_v19 = vmul.f32 %v4943_v21, %v5328_v63 }
 0x259   : > { %v2668_v62 = vadd.f32 %v3463_v61, %v2075_v22  ;;  %v3466_v43 = vadd.f32 %v3465_v35, %v3464_v38  ;;  %v3529_v17 = vpop.f32.mrb[87].mxu1  ;;  %v2078_v61 = vadd.f32 %v2062_v44, %v1930_v5  ;;  %v1931_v38 = vadd.f32 %v1915_v27, %v1783_v25 }
 0x25a   : > { %v3530_v33 = vadd.f32 %v3529_v17, %v3528_v18  ;;  %v1784_v35 = vadd.f32 %v1768_v19, %v1620_v26 }
 0x25b   : > { %v5087_v1 = vadd.f32 %v3527_v39, %v2668_v62  ;;  %v2671_v6 = vadd.f32 %v3466_v43, %v2076_v48  ;;  %v1916_v39 = vmul.f32 %v4949_v57, %v4909_v49  ;;  %v2079_v17 = vadd.f32 %v2063_v12, %v1931_v38 }
 0x25d   : > { %v5091_v52 = vadd.f32 %v3530_v33, %v2671_v6  ;;  %v3467_v11 = vpop.f32.mrb[88].mxu0  ;;  %v1932_v30 = vadd.f32 %v1916_v39, %v1784_v35 }
 0x25e   : > { %v3468_v34 = vpop.f32.mrb[89].mxu0 }
 0x25f   : > { %v3469_v59 = vadd.f32 %v3468_v34, %v3467_v11  ;;  %v3470_v42 = vpop.f32.mrb[90].mxu0  ;;  %v2080_v57 = vadd.f32 %v2064_v16, %v1932_v30 }
 0x260   : > { %v3531_v53 = vpop.f32.mrb[88].mxu1  ;;  %v3471_v46 = vpop.f32.mrb[91].mxu0 }
 0x261   : > { %v3532_v54 = vpop.f32.mrb[89].mxu1  ;;  %v2676_v22 = vadd.f32 %v3469_v59, %v2077_v8  ;;  %v3472_v41 = vadd.f32 %v3471_v46, %v3470_v42 }
 0x262   : > { %v3533_v4 = vadd.f32 %v3532_v54, %v3531_v53  ;;  %v3534_v60 = vpop.f32.mrb[90].mxu1 }
 0x263   : > { %v3535_v51 = vpop.f32.mrb[91].mxu1  ;;  %v2679_v28 = vadd.f32 %v3472_v41, %v2078_v61 }
 0x264   : > { %v3536_v40 = vadd.f32 %v3535_v51, %v3534_v60  ;;  %v5103_v18 = vadd.f32 %v3533_v4, %v2676_v22 }
 0x265   : > { %v3473_v62 = vpop.f32.mrb[92].mxu0 }
 0x266   : > { %v5107_v21 = vadd.f32 %v3536_v40, %v2679_v28  ;;  %v3474_v43 = vpop.f32.mrb[93].mxu0 }
 0x267   : > { %v3475_v29 = vadd.f32 %v3474_v43, %v3473_v62  ;;  %v3476_v55 = vpop.f32.mrb[94].mxu0 }
 0x268   : > { %v3537_v48 = vpop.f32.mrb[92].mxu1  ;;  %v3477_v49 = vpop.f32.mrb[95].mxu0 }
 0x269   : > { %v3538_v24 = vpop.f32.mrb[93].mxu1  ;;  %v2684_v9 = vadd.f32 %v3475_v29, %v2079_v17  ;;  %v3478_v37 = vadd.f32 %v3477_v49, %v3476_v55 }
 0x26a   : > { %v3539_v13 = vadd.f32 %v3538_v24, %v3537_v48  ;;  %v3540_v33 = vpop.f32.mrb[94].mxu1 }
 0x26b   : > { %v3541_v20 = vpop.f32.mrb[95].mxu1  ;;  %v2687_v32 = vadd.f32 %v3478_v37, %v2080_v57 }
 0x26c   : > { %v3542_v10 = vadd.f32 %v3541_v20, %v3540_v33  ;;  %v5109_v6 = vadd.f32 %v3539_v13, %v2684_v9 }
 0x26d   : > { %v3559_v50 = vpop.f32.mrb[96].mxu0 }
 0x26e   : > { %v5111_v23 = vadd.f32 %v3542_v10, %v2687_v32  ;;  %v3560_v44 = vpop.f32.mrb[97].mxu0 }
 0x26f   : > { %v3561_v11 = vadd.f32 %v3560_v44, %v3559_v50  ;;  %v3562_v27 = vpop.f32.mrb[98].mxu0 }
 0x270   : > { %v3623_v2 = vpop.f32.mrb[96].mxu1  ;;  %v3563_v5 = vpop.f32.mrb[99].mxu0 }
 0x271   : > { %v3624_v25 = vpop.f32.mrb[97].mxu1  ;;  %v2822_v8 = vadd.f32 %v3561_v11, %v4979_v14  ;;  %v3564_v59 = vadd.f32 %v3563_v5, %v3562_v27 }
 0x272   : > { %v3625_v53 = vadd.f32 %v3624_v25, %v3623_v2  ;;  %v3626_v34 = vpop.f32.mrb[98].mxu1 }
 0x273   : > { %v3627_v54 = vpop.f32.mrb[99].mxu1  ;;  %v2825_v26 = vadd.f32 %v3564_v59, %v4989_v58 }
 0x274   : > { %v3628_v42 = vadd.f32 %v3627_v54, %v3626_v34  ;;  %v2919_v47 = vadd.f32 %v3625_v53, %v2822_v8 }
 0x275   : > { %v3565_v60 = vpop.f32.mrb[100].mxu0 }
 0x276   : > { %v2922_v4 = vadd.f32 %v3628_v42, %v2825_v26  ;;  %v3566_v63 = vpop.f32.mrb[101].mxu0 }
 0x277   : > { %v3567_v22 = vadd.f32 %v3566_v63, %v3565_v60  ;;  %v3568_v41 = vpop.f32.mrb[102].mxu0 }
 0x278   : > { %v3629_v46 = vpop.f32.mrb[100].mxu1  ;;  %v3371_v19 = vpack.c.bf16 %v2922_v4, %v2919_v47  ;;  %v3569_v40 = vpop.f32.mrb[103].mxu0 }
 0x279   : > { %v3630_v61 = vpop.f32.mrb[101].mxu1  ;;  %v2830_v14 = vadd.f32 %v3567_v22, %v5007_v36  ;;  %v3570_v58 = vadd.f32 %v3569_v40, %v3568_v41 }
 0x27a   : > { %v3631_v51 = vadd.f32 %v3630_v61, %v3629_v46  ;;  %v3632_v38 = vpop.f32.mrb[102].mxu1  ;;  %3372 = vst [vmem:[%s5117_s14] sm:$0xff] %v3371_v19  }
 0x27b   : > { %v3633_v12 = vpop.f32.mrb[103].mxu1  ;;  %v2833_v35 = vadd.f32 %v3570_v58, %v5011_v56 }
 0x27c   : > { %v3634_v39 = vadd.f32 %v3633_v12, %v3632_v38  ;;  %v2927_v28 = vadd.f32 %v3631_v51, %v2830_v14 }
 0x27d   : > { %v3571_v62 = vpop.f32.mrb[104].mxu0 }
 0x27e   : > { %v2930_v16 = vadd.f32 %v3634_v39, %v2833_v35  ;;  %v3572_v43 = vpop.f32.mrb[105].mxu0 }
 0x27f   : > { %v3573_v30 = vadd.f32 %v3572_v43, %v3571_v62  ;;  %v3574_v24 = vpop.f32.mrb[106].mxu0 }
 0x280   : > { %v3635_v48 = vpop.f32.mrb[104].mxu1  ;;  %v3376_v17 = vpack.c.bf16 %v2930_v16, %v2927_v28  ;;  %v3575_v33 = vpop.f32.mrb[107].mxu0 }
 0x281   : > { %v3636_v29 = vpop.f32.mrb[105].mxu1  ;;  %v2838_v36 = vadd.f32 %v3573_v30, %v5023_v31  ;;  %v3576_v49 = vadd.f32 %v3575_v33, %v3574_v24 }
 0x282   : > { %v3637_v55 = vadd.f32 %v3636_v29, %v3635_v48  ;;  %v3638_v13 = vpop.f32.mrb[106].mxu1  ;;  %3408 = vst [vmem:[%s5117_s14 + $0x8] sm:$0xff] %v3376_v17  }
 0x283   : > { %v3639_v57 = vpop.f32.mrb[107].mxu1  ;;  %v2841_v56 = vadd.f32 %v3576_v49, %v5027_v15 }
 0x284   : > { %v3640_v9 = vadd.f32 %v3639_v57, %v3638_v13  ;;  %v2935_v37 = vadd.f32 %v3637_v55, %v2838_v36 }
 0x285   : > { %v3577_v10 = vpop.f32.mrb[108].mxu0 }
 0x286   : > { %v2938_v20 = vadd.f32 %v3640_v9, %v2841_v56  ;;  %v3578_v50 = vpop.f32.mrb[109].mxu0 }
 0x287   : > { %v3579_v44 = vadd.f32 %v3578_v50, %v3577_v10  ;;  %v3580_v25 = vpop.f32.mrb[110].mxu0 }
 0x288   : > { %v3641_v32 = vpop.f32.mrb[108].mxu1  ;;  %v3381_v2 = vpack.c.bf16 %v2938_v20, %v2935_v37  ;;  %v3581_v34 = vpop.f32.mrb[111].mxu0 }
 0x289   : > { %v3642_v11 = vpop.f32.mrb[109].mxu1  ;;  %v2846_v31 = vadd.f32 %v3579_v44, %v5047_v7  ;;  %v3582_v5 = vadd.f32 %v3581_v34, %v3580_v25 }
 0x28a   : > { %v3643_v27 = vadd.f32 %v3642_v11, %v3641_v32  ;;  %v3644_v53 = vpop.f32.mrb[110].mxu1  ;;  %3409 = vst [vmem:[%s5117_s14 + $0x10] sm:$0xff] %v3381_v2  }
 0x28b   : > { %v3645_v8 = vpop.f32.mrb[111].mxu1  ;;  %v2849_v15 = vadd.f32 %v3582_v5, %v5051_v45 }
 0x28c   : > { %v3646_v59 = vadd.f32 %v3645_v8, %v3644_v53  ;;  %v2943_v54 = vadd.f32 %v3643_v27, %v2846_v31 }
 0x28d   : > { %v3583_v47 = vpop.f32.mrb[112].mxu0 }
 0x28e   : > { %v2946_v42 = vadd.f32 %v3646_v59, %v2849_v15  ;;  %v3584_v4 = vpop.f32.mrb[113].mxu0 }
 0x28f   : > { %v3585_v46 = vadd.f32 %v3584_v4, %v3583_v47  ;;  %v3586_v19 = vpop.f32.mrb[114].mxu0 }
 0x290   : > { %v3647_v26 = vpop.f32.mrb[112].mxu1  ;;  %v3386_v60 = vpack.c.bf16 %v2946_v42, %v2943_v54  ;;  %v3587_v41 = vpop.f32.mrb[115].mxu0 }
 0x291   : > { %v3648_v63 = vpop.f32.mrb[113].mxu1  ;;  %v2854_v7 = vadd.f32 %v3585_v46, %v5063_v0  ;;  %v3588_v51 = vadd.f32 %v3587_v41, %v3586_v19 }
 0x292   : > { %v3649_v22 = vadd.f32 %v3648_v63, %v3647_v26  ;;  %v3650_v61 = vpop.f32.mrb[114].mxu1  ;;  %3410 = vst [vmem:[%s5117_s14 + $0x18] sm:$0xff] %v3386_v60  }
 0x293   : > { %v3651_v38 = vpop.f32.mrb[115].mxu1  ;;  %v2857_v45 = vadd.f32 %v3588_v51, %v5067_v3 }
 0x294   : > { %v3652_v40 = vadd.f32 %v3651_v38, %v3650_v61  ;;  %v2951_v14 = vadd.f32 %v3649_v22, %v2854_v7 }
 0x295   : > { %v3589_v12 = vpop.f32.mrb[116].mxu0 }
 0x296   : > { %v2954_v58 = vadd.f32 %v3652_v40, %v2857_v45  ;;  %v3590_v28 = vpop.f32.mrb[117].mxu0 }
 0x297   : > { %v3591_v16 = vadd.f32 %v3590_v28, %v3589_v12  ;;  %v3592_v48 = vpop.f32.mrb[118].mxu0 }
 0x298   : > { %v3653_v39 = vpop.f32.mrb[116].mxu1  ;;  %v3391_v35 = vpack.c.bf16 %v2954_v58, %v2951_v14  ;;  %v3593_v30 = vpop.f32.mrb[119].mxu0 }
 0x299   : > { %v3654_v62 = vpop.f32.mrb[117].mxu1  ;;  %v2862_v0 = vadd.f32 %v3591_v16, %v5087_v1  ;;  %v3594_v29 = vadd.f32 %v3593_v30, %v3592_v48 }
 0x29a   : > { %v3655_v43 = vadd.f32 %v3654_v62, %v3653_v39  ;;  %v3656_v17 = vpop.f32.mrb[118].mxu1  ;;  %3411 = vst [vmem:[%s5117_s14 + $0x20] sm:$0xff] %v3391_v35  }
 0x29b   : > { %v3657_v24 = vpop.f32.mrb[119].mxu1  ;;  %v2865_v3 = vadd.f32 %v3594_v29, %v5091_v52 }
 0x29c   : > { %v3658_v55 = vadd.f32 %v3657_v24, %v3656_v17  ;;  %v2959_v13 = vadd.f32 %v3655_v43, %v2862_v0 }
 0x29d   : > { %v3595_v36 = vpop.f32.mrb[120].mxu0 }
 0x29e   : > { %v2962_v33 = vadd.f32 %v3658_v55, %v2865_v3  ;;  %v3596_v57 = vpop.f32.mrb[121].mxu0 }
 0x29f   : > { %v3597_v37 = vadd.f32 %v3596_v57, %v3595_v36  ;;  %v3598_v20 = vpop.f32.mrb[122].mxu0 }
 0x2a0   : > { %v3659_v49 = vpop.f32.mrb[120].mxu1  ;;  %v3396_v9 = vpack.c.bf16 %v2962_v33, %v2959_v13  ;;  %v3599_v50 = vpop.f32.mrb[123].mxu0 }
 0x2a1   : > { %v3660_v56 = vpop.f32.mrb[121].mxu1  ;;  %v2870_v1 = vadd.f32 %v3597_v37, %v5103_v18  ;;  %v3600_v2 = vadd.f32 %v3599_v50, %v3598_v20 }
 0x2a2   : > { %v3661_v10 = vadd.f32 %v3660_v56, %v3659_v49  ;;  %v3662_v32 = vpop.f32.mrb[122].mxu1  ;;  %3412 = vst [vmem:[%s5117_s14 + $0x28] sm:$0xff] %v3396_v9  }
 0x2a3   : > { %v3663_v44 = vpop.f32.mrb[123].mxu1  ;;  %v2873_v52 = vadd.f32 %v3600_v2, %v5107_v21 }
 0x2a4   : > { %v3664_v11 = vadd.f32 %v3663_v44, %v3662_v32  ;;  %v2967_v25 = vadd.f32 %v3661_v10, %v2870_v1 }
 0x2a5   : > { %v3601_v53 = vpop.f32.mrb[124].mxu0 }
 0x2a6   : > { %v2970_v27 = vadd.f32 %v3664_v11, %v2873_v52  ;;  %v3602_v31 = vpop.f32.mrb[125].mxu0 }
 0x2a7   : > { %v3603_v8 = vadd.f32 %v3602_v31, %v3601_v53  ;;  %v3604_v54 = vpop.f32.mrb[126].mxu0 }
 0x2a8   : > { %v3665_v34 = vpop.f32.mrb[124].mxu1  ;;  %v3401_v5 = vpack.c.bf16 %v2970_v27, %v2967_v25  ;;  %v3605_v18 = vpop.f32.mrb[127].mxu0 }
 0x2a9   : > { %v3666_v59 = vpop.f32.mrb[125].mxu1  ;;  %v2878_v47 = vadd.f32 %v3603_v8, %v5109_v6  ;;  %v3606_v26 = vadd.f32 %v3605_v18, %v3604_v54 }
 0x2aa   : > { %v3667_v15 = vadd.f32 %v3666_v59, %v3665_v34  ;;  %v3668_v42 = vpop.f32.mrb[126].mxu1  ;;  %3413 = vst [vmem:[%s5117_s14 + $0x30] sm:$0xff] %v3401_v5  }
 0x2ab   : > { %v3669_v4 = vpop.f32.mrb[127].mxu1  ;;  %v2881_v46 = vadd.f32 %v3606_v26, %v5111_v23 }
 0x2ac   : > { %v3670_v60 = vadd.f32 %v3669_v4, %v3668_v42  ;;  %v2975_v21 = vadd.f32 %v3667_v15, %v2878_v47  ;;  %3068 = sbr.rel (!%p5329_p10) target bundleno = 719 (0x2cf), region = 56 }
 0x2ae   : > { %v2978_v63 = vadd.f32 %v3670_v60, %v2881_v46 }
 0x2b0   : > { %v3406_v19 = vpack.c.bf16 %v2978_v63, %v2975_v21 }
 0x2b2   : > { %3414 = vst [vmem:[%s5117_s14 + $0x38] sm:$0xff] %v3406_v19  }
 0x2b3   : > { %s5336_s17 = smov (!%p3071_p1, %s3070_s17), 16 }
 0x2b4   : > { %s5148_s18 = sshll.u32 %s5336_s17, 6 }
 0x2b5   : > { %s3075_s19 = ssub.s32 1024, %s5148_s18 }
 0x2b6   : > { %3076 = vsyncadd %s5143_s16, %s3075_s19  ;;  %p3345_p2 = scmp.ne.s32.totalorder %s5148_s18, 0  ;;  %s3367_s20 = sshll.u32 %s4052_s25, 10 }
 0x2b7   : > { %s5157_s28 = scalar_lea.hbm %s5210_s6, %s3367_s20  ;;  %s3081_s12 = sshll.u32 %s5117_s14, 4  ;;  %s5160_s12 = int_to_ptr.vmem [resolvable:$true] %s3081_s12 }
 0x2b8   : > { %s3911_s11 = scalar_lea.vmem %s5160_s12, %s5148_s18  ;;  %s3993_s29 = smov [#allocation7]  }
 0x2b9   : > { %p3912_p3 = scmp.ne.s32.totalorder %s5160_s12, %s3911_s11  ;;  %s3915_s10 = sshll.u32 %s3993_s29, 4  ;;  %s3916_s10 = int_to_ptr.vmem [resolvable:$false] %s3915_s10 }
 0x2ba   : > { %s3917_s25 = scalar_lea.vmem %s3916_s10, 2048  ;;  %p3918_p8 = scmp.lt.s32.totalorder %s5160_s12, %s3916_s10 }
 0x2bb   : > { %p3913_p4 = pnand %p3912_p3, %p3345_p2  ;;  %p3919_p11 = scmp.lt.s32.totalorder %s3917_s25, %s3911_s11 }
 0x2bd   : > { %p3914_p7 = pneg %p3913_p4  ;;  %p3920_p13 = por %p3919_p11, %p3918_p8 }
 0x2bf   : > { %p3921_p0 = pnand %p3920_p13, %p3914_p7 }
 0x2c1   : > { %3924 = shalt.err (!%p3921_p0)
}
 0x2c2   : > { %s3925_s13 = scalar_lea.hbm %s5157_s28, %s5148_s18  ;;  %s3929_s14 = scalar_lea.hbm %s5210_s6, 1920 }
 0x2c3   : > { %p3926_p5 = scmp.ne.s32.totalorder %s5157_s28, %s3925_s13  ;;  %p3930_p12 = scmp.lt.u32.totalorder %s5157_s28, %s5210_s6 }
 0x2c4   : > { %p3931_p10 = scmp.lt.u32.totalorder %s3929_s14, %s3925_s13  ;;  %p3933_p3 = scmp.lt.u32.totalorder %s3925_s13, %s5157_s28 }
 0x2c5   : > { %p3927_p6 = pnand %p3926_p5, %p3345_p2 }
 0x2c6   : > { %p3932_p1 = por %p3931_p10, %p3930_p12 }
 0x2c7   : > { %p3928_p9 = pneg %p3927_p6 }
 0x2c8   : > { %p3934_p4 = por %p3933_p3, %p3932_p1 }
 0x2ca   : > { %p3935_p7 = pnand %p3934_p4, %p3928_p9 }
 0x2cc   : > { %3938 = shalt.err (!%p3935_p7)
}
 0x2cd   : > { %s3994_s20 = smov 64   ;;  %s3995_s26 = smov 4  }
 0x2ce   : > { %3087 = dma.vmem_to_hbm [thread:$0]  (%p3345_p2), %s5160_s12, %s5148_s18, %s5157_s28, %s5143_s16, %s3994_s20, %s3994_s20, %s3995_s26  }
 0x2cf PF: > { %p3695_p8 = scmp.ge.s32.totalorder %s3981_s24, 2  ;;  %s3096_s7 = sand.u32 1, %s3969_s21  }
 0x2d0   : > { %p5330_p11 = scmp.ne.s32.totalorder %s5250_s8, 0  ;;  %s3097_s11 = scalar_lea.sflag [#allocation4], %s3096_s7 }
 0x2d2   : > { %p3688_p13 = pnand %p3695_p8, %p5330_p11 }
 0x2d4   : > { %3964 = dma.done.wait (!%p3688_p13), %s3097_s11, 1024  }
 0x2d5   : > { %3966 = vsyncadd (!%p3688_p13), %s3097_s11, 4294966272  ;;  %p18_p0 = scmp.ge.s32.totalorder %s4056_s27, 4   ;;  %s5331_s21 = smov %s3973_s22 }
 0x2d6   : > { %s5332_s22 = smov %s3977_s23  ;;  %s5333_s23 = smov %s4067_s30 }
 0x2d7   : > { %s5334_s24 = smov %s4056_s27  ;;  %20 = sbr.rel (!%p18_p0) target bundleno = 5 (0x5), region = 91 }
 0x2de   :  { %3102 = vsyncpa [#allocation3], 1 }
 0x2df   :  { %3104 = vsyncpa [#allocation3 + $0x1], 1 }
 0x2e0   :  { %3105 = vsyncpa [#allocation6], 1 }
 0x2e1   :  { %3106 = vsyncpa [#allocation4], 1 }
 0x2e2   :  { %3108 = vsyncpa [#allocation4 + $0x1], 1 }

</bundles_post_ra>
